<compile_context>
chip_gen: v7x
topology: tpu7x:2x2x1
jax: 0.10.0
libtpu: 0.0.40
codegen_flags: <defaults>
</compile_context>

<pallas_src>
import functools

import jax
import jax.numpy as jnp
from jax.experimental import pallas as pl
from jax.experimental.pallas import tpu as pltpu

POOL_K = 48
POOL_S = 24
LANE = 128


def _mean_v_divide_t_kernel(t_out,
                            v_ref,
                            w1_ref, b1_ref,
                            w2_ref, b2_ref,
                            w3_ref, b3_ref,
                            w4_ref, b4_ref,
                            out_ref):
    x = v_ref[...]  # (bm, (t_out+1)*POOL_S, D) float32

    # Non-overlapping 24-row chunk sums; each AvgPool window (k=48, s=24) is
    # the sum of two adjacent chunks -> only 96 rows reduced, not 144.
    chunk_sums = [
        jnp.sum(x[:, i * POOL_S:(i + 1) * POOL_S, :], axis=1)
        for i in range(t_out + 1)
    ]
    inv_k = jnp.float32(1.0 / POOL_K)

    # Linear(3*D -> 512) with BN1 + bias folded into the weights; computed as
    # t_out K=D dots summed (w1 stored (t_out, D, 512), window-major to match
    # the PyTorch flatten order of (B, T_out, D)).  No lane concatenate.
    acc = None
    for k in range(t_out):
        win = ((chunk_sums[k] + chunk_sums[k + 1]) * inv_k).astype(w1_ref.dtype)
        part = jnp.dot(win, w1_ref[k], preferred_element_type=jnp.float32)
        acc = part if acc is None else acc + part
    h = jnp.maximum(acc + b1_ref[...], 0.0)      # ReLU; Dropout = identity (eval)

    # Linear(512 -> 256) with BN2 + bias folded into the weights.
    h = jnp.dot(h.astype(w2_ref.dtype), w2_ref[...],
                preferred_element_type=jnp.float32) + b2_ref[...]
    h = jnp.maximum(h, 0.0)                       # ReLU; Dropout = identity (eval)

    # outputLayer: Linear(256 -> 128) then Linear(128 -> padded classes).
    h = jnp.dot(h, w3_ref[...], preferred_element_type=jnp.float32) + b3_ref[...]
    out = jnp.dot(h, w4_ref[...], preferred_element_type=jnp.float32) + b4_ref[...]

    out_ref[...] = out.astype(out_ref.dtype)


def fold_params(params, video_emb_dim):
    """One-time parameter prep: fold eval-BN + bias into weights, cast big
    weights to bf16, pad the last layer to a lane-dense 128-wide output."""
    eps = 1e-5
    f32 = jnp.float32

    s1 = params["bn1_gamma"] / jnp.sqrt(params["bn1_var"] + eps)
    t1 = params["bn1_beta"] - params["bn1_mean"] * s1
    s2 = params["bn2_gamma"] / jnp.sqrt(params["bn2_var"] + eps)
    t2 = params["bn2_beta"] - params["bn2_mean"] * s2

    in_dim, h1 = params["w1"].shape
    t_out = in_dim // video_emb_dim
    assert t_out * video_emb_dim == in_dim, "w1 rows must be t_out * video_emb_dim"

    w1 = (params["w1"].astype(f32) * s1[None, :]).reshape(t_out, video_emb_dim, h1)
    b1 = (params["b1"].astype(f32) * s1 + t1).reshape(1, -1)
    w2 = params["w2"].astype(f32) * s2[None, :]
    b2 = (params["b2"].astype(f32) * s2 + t2).reshape(1, -1)

    num_classes = params["w4"].shape[1]
    n_pad = max(LANE, ((num_classes + LANE - 1) // LANE) * LANE)
    w4 = jnp.zeros((params["w4"].shape[0], n_pad), f32)
    w4 = w4.at[:, :num_classes].set(params["w4"].astype(f32))
    b4 = jnp.zeros((1, n_pad), f32).at[0, :num_classes].set(params["b4"].astype(f32))

    # TODO(synk): on v7x, fp8 weights would halve DMA bytes again (no int8 MXU
    # path there); bf16 is the safe cross-generation choice used here.
    return dict(
        t_out=t_out,
        num_classes=num_classes,
        w1=w1.astype(jnp.bfloat16), b1=b1.astype(f32),
        w2=w2.astype(jnp.bfloat16), b2=b2.astype(f32),
        w3=params["w3"].astype(f32), b3=params["b3"].reshape(1, -1).astype(f32),
        w4=w4, b4=b4,
    )


def mean_v_divide_t_forward(audio_feat, video_feat, folded):
    """audio_feat is unused (mirrors the PyTorch forward)."""
    del audio_feat
    B, T, D = video_feat.shape
    t_out = folded["t_out"]
    assert (T - POOL_K) // POOL_S + 1 == t_out, "T inconsistent with folded w1"
    t_used = (t_out + 1) * POOL_S          # rows actually consumed by pooling
    assert t_used <= T

    num_classes = folded["num_classes"]
    h1 = folded["w1"].shape[2]
    h2 = folded["w2"].shape[1]
    h3 = folded["w3"].shape[1]
    n_pad = folded["w4"].shape[1]

    bm = B if B <= 128 else 128            # batch tile; weights stay resident
    grid = (pl.cdiv(B, bm),)

    args = (
        video_feat.astype(jnp.float32),
        folded["w1"], folded["b1"],
        folded["w2"], folded["b2"],
        folded["w3"], folded["b3"],
        folded["w4"], folded["b4"],
    )

    def _const_spec(a):
        nd = a.ndim
        return pl.BlockSpec(a.shape, (lambda n: (lambda i: (0,) * n))(nd))

    in_specs = [pl.BlockSpec((bm, t_used, D), lambda i: (i, 0, 0))]
    in_specs += [_const_spec(a) for a in args[1:]]

    flops = 2 * B * (t_out * D * h1 + h1 * h2 + h2 * h3 + h3 * n_pad) \
        + B * t_used * D
    bytes_accessed = (B * t_used * D * 4
                      + sum(int(a.nbytes) for a in args[1:])
                      + B * n_pad * 4)

    out = pl.pallas_call(
        functools.partial(_mean_v_divide_t_kernel, t_out),
        out_shape=jax.ShapeDtypeStruct((B, n_pad), jnp.float32),
        grid=grid,
        in_specs=in_specs,
        out_specs=pl.BlockSpec((bm, n_pad), lambda i: (i, 0)),
        compiler_params=pltpu.CompilerParams(
            dimension_semantics=("parallel",)),
        cost_estimate=pl.CostEstimate(flops=int(flops), transcendentals=0,
                                      bytes_accessed=int(bytes_accessed)),
    )(*args)
    return out[:, :num_classes]


def init_params(key, video_emb_dim, num_classes):
    ks = jax.random.split(key, 12)
    in_dim = 3 * video_emb_dim

    def lin(k, fan_in, fan_out):
        kw, kb = jax.random.split(k)
        w = jax.random.normal(kw, (fan_in, fan_out), jnp.float32) * 0.02
        b = jax.random.normal(kb, (fan_out,), jnp.float32) * 0.01
        return w, b

    w1, b1 = lin(ks[0], in_dim, 512)
    w2, b2 = lin(ks[1], 512, 256)
    w3, b3 = lin(ks[2], 256, 128)
    w4, b4 = lin(ks[3], 128, num_classes)

    return dict(
        w1=w1, b1=b1, w2=w2, b2=b2, w3=w3, b3=b3, w4=w4, b4=b4,
        bn1_gamma=1.0 + 0.1 * jax.random.normal(ks[4], (512,), jnp.float32),
        bn1_beta=0.1 * jax.random.normal(ks[5], (512,), jnp.float32),
        bn1_mean=0.05 * jax.random.normal(ks[6], (512,), jnp.float32),
        bn1_var=1.0 + 0.1 * jax.random.uniform(ks[7], (512,), jnp.float32),
        bn2_gamma=1.0 + 0.1 * jax.random.normal(ks[8], (256,), jnp.float32),
        bn2_beta=0.1 * jax.random.normal(ks[9], (256,), jnp.float32),
        bn2_mean=0.05 * jax.random.normal(ks[10], (256,), jnp.float32),
        bn2_var=1.0 + 0.1 * jax.random.uniform(ks[11], (256,), jnp.float32),
    )


def _reference_forward(video_feat, params):
    """Pure-JAX f32 reference matching the PyTorch module (eval mode)."""
    B, T, D = video_feat.shape
    t_out = (T - POOL_K) // POOL_S + 1
    pooled = jnp.stack(
        [jnp.mean(video_feat[:, i * POOL_S:i * POOL_S + POOL_K, :], axis=1)
         for i in range(t_out)], axis=1)              # (B, t_out, D)
    feat = pooled.reshape(B, t_out * D)               # window-major flatten
    eps = 1e-5
    h = feat @ params["w1"] + params["b1"]
    h = ((h - params["bn1_mean"]) / jnp.sqrt(params["bn1_var"] + eps)
         * params["bn1_gamma"] + params["bn1_beta"])
    h = jnp.maximum(h, 0.0)
    h = h @ params["w2"] + params["b2"]
    h = ((h - params["bn2_mean"]) / jnp.sqrt(params["bn2_var"] + eps)
         * params["bn2_gamma"] + params["bn2_beta"])
    h = jnp.maximum(h, 0.0)
    h = h @ params["w3"] + params["b3"]
    return h @ params["w4"] + params["b4"]


if __name__ == "__main__":
    key = jax.random.PRNGKey(0)
    k_param, k_vid, k_aud = jax.random.split(key, 3)

    # T must give exactly 3 pooling windows: (T - 48)//24 + 1 == 3  ->  T = 96
    B, T, video_emb_dim = 8, 96, 64
    audio_emb_dim = 32           # unused by forward, kept for interface parity
    num_classes = 10

    params = init_params(k_param, video_emb_dim, num_classes)
    folded = fold_params(params, video_emb_dim)

    video_feat = jax.random.normal(k_vid, (B, T, video_emb_dim), jnp.float32)
    audio_feat = jax.random.normal(k_aud, (B, 16, audio_emb_dim), jnp.float32)

    out = mean_v_divide_t_forward(audio_feat, video_feat, folded)
    jax.block_until_ready(out)
    assert out.shape == (B, num_classes)

    ref = _reference_forward(video_feat, params)
    max_err = float(jnp.max(jnp.abs(out - ref)))
    assert max_err < 5e-3, f"mismatch vs reference: {max_err}"

    print("KERNEL_OK")
</pallas_src>

<mosaic_0001>
module attributes {stable_mosaic.version = 11 : i64} {
  func.func @_mean_v_divide_t_kernel(%arg0: i32, %arg1: memref<8x96x64xf32, #tpu.memory_space<vmem>>, %arg2: memref<3x64x512xbf16, #tpu.memory_space<vmem>>, %arg3: memref<1x512xf32, #tpu.memory_space<vmem>>, %arg4: memref<512x256xbf16, #tpu.memory_space<vmem>>, %arg5: memref<1x256xf32, #tpu.memory_space<vmem>>, %arg6: memref<256x128xf32, #tpu.memory_space<vmem>>, %arg7: memref<1x128xf32, #tpu.memory_space<vmem>>, %arg8: memref<128x128xf32, #tpu.memory_space<vmem>>, %arg9: memref<1x128xf32, #tpu.memory_space<vmem>>, %arg10: memref<8x128xf32, #tpu.memory_space<vmem>>) attributes {dimension_semantics = [#tpu.dimension_semantics<parallel>], iteration_bounds = array<i64: 1>, scalar_prefetch = 0 : i64, scratch_operands = 0 : i64, tpu.core_type = #tpu.core_type<tc>, window_params = [{transform_indices = @transform_0, window_bounds = array<i64: 8, 96, 64>}, {pipeline_mode = #tpu.pipeline_mode<synchronous>, transform_indices = @transform_1, window_bounds = array<i64: 3, 64, 512>}, {pipeline_mode = #tpu.pipeline_mode<synchronous>, transform_indices = @transform_2, window_bounds = array<i64: 1, 512>}, {pipeline_mode = #tpu.pipeline_mode<synchronous>, transform_indices = @transform_3, window_bounds = array<i64: 512, 256>}, {pipeline_mode = #tpu.pipeline_mode<synchronous>, transform_indices = @transform_4, window_bounds = array<i64: 1, 256>}, {pipeline_mode = #tpu.pipeline_mode<synchronous>, transform_indices = @transform_5, window_bounds = array<i64: 256, 128>}, {pipeline_mode = #tpu.pipeline_mode<synchronous>, transform_indices = @transform_6, window_bounds = array<i64: 1, 128>}, {pipeline_mode = #tpu.pipeline_mode<synchronous>, transform_indices = @transform_7, window_bounds = array<i64: 128, 128>}, {pipeline_mode = #tpu.pipeline_mode<synchronous>, transform_indices = @transform_8, window_bounds = array<i64: 1, 128>}, {transform_indices = @transform_9, window_bounds = array<i64: 8, 128>}]} {
    %c0 = arith.constant 0 : index
    %c0_0 = arith.constant 0 : index
    %c0_1 = arith.constant 0 : index
    %0 = vector.load %arg1[%c0, %c0_0, %c0_1] : memref<8x96x64xf32, #tpu.memory_space<vmem>>, vector<8x96x64xf32>
    %1 = vector.extract_strided_slice %0 {offsets = [0, 0, 0], sizes = [8, 24, 64], strides = [1, 1, 1]} : vector<8x96x64xf32> to vector<8x24x64xf32>
    %cst = arith.constant dense<0.000000e+00> : vector<8x64xf32>
    %2 = vector.multi_reduction <add>, %1, %cst [1] : vector<8x24x64xf32> to vector<8x64xf32>
    %3 = vector.extract_strided_slice %0 {offsets = [0, 24, 0], sizes = [8, 24, 64], strides = [1, 1, 1]} : vector<8x96x64xf32> to vector<8x24x64xf32>
    %cst_2 = arith.constant dense<0.000000e+00> : vector<8x64xf32>
    %4 = vector.multi_reduction <add>, %3, %cst_2 [1] : vector<8x24x64xf32> to vector<8x64xf32>
    %5 = vector.extract_strided_slice %0 {offsets = [0, 48, 0], sizes = [8, 24, 64], strides = [1, 1, 1]} : vector<8x96x64xf32> to vector<8x24x64xf32>
    %cst_3 = arith.constant dense<0.000000e+00> : vector<8x64xf32>
    %6 = vector.multi_reduction <add>, %5, %cst_3 [1] : vector<8x24x64xf32> to vector<8x64xf32>
    %7 = vector.extract_strided_slice %0 {offsets = [0, 72, 0], sizes = [8, 24, 64], strides = [1, 1, 1]} : vector<8x96x64xf32> to vector<8x24x64xf32>
    %cst_4 = arith.constant dense<0.000000e+00> : vector<8x64xf32>
    %8 = vector.multi_reduction <add>, %7, %cst_4 [1] : vector<8x24x64xf32> to vector<8x64xf32>
    %9 = arith.addf %2, %4 : vector<8x64xf32>
    %cst_5 = arith.constant 0.020833334 : f32
    %10 = vector.broadcast %cst_5 : f32 to vector<8x64xf32>
    %11 = arith.mulf %9, %10 : vector<8x64xf32>
    %12 = arith.truncf %11 : vector<8x64xf32> to vector<8x64xbf16>
    %c0_6 = arith.constant 0 : index
    %c0_7 = arith.constant 0 : index
    %c0_8 = arith.constant 0 : index
    %13 = vector.load %arg2[%c0_6, %c0_7, %c0_8] : memref<3x64x512xbf16, #tpu.memory_space<vmem>>, vector<1x64x512xbf16>
    %14 = vector.shape_cast %13 : vector<1x64x512xbf16> to vector<64x512xbf16>
    %cst_9 = arith.constant dense<0.000000e+00> : vector<8x512xf32>
    %15 = tpu.matmul %12, %14, %cst_9 {dimension_numbers = #tpu.dot_dimension_numbers<[1], [0], [0], [1], [0, 0, 1, 1], [], []>} : vector<8x64xbf16>, vector<64x512xbf16>, vector<8x512xf32> -> vector<8x512xf32>
    %16 = arith.addf %4, %6 : vector<8x64xf32>
    %cst_10 = arith.constant 0.020833334 : f32
    %17 = vector.broadcast %cst_10 : f32 to vector<8x64xf32>
    %18 = arith.mulf %16, %17 : vector<8x64xf32>
    %19 = arith.truncf %18 : vector<8x64xf32> to vector<8x64xbf16>
    %c1 = arith.constant 1 : index
    %c0_11 = arith.constant 0 : index
    %c0_12 = arith.constant 0 : index
    %20 = vector.load %arg2[%c1, %c0_11, %c0_12] : memref<3x64x512xbf16, #tpu.memory_space<vmem>>, vector<1x64x512xbf16>
    %21 = vector.shape_cast %20 : vector<1x64x512xbf16> to vector<64x512xbf16>
    %cst_13 = arith.constant dense<0.000000e+00> : vector<8x512xf32>
    %22 = tpu.matmul %19, %21, %cst_13 {dimension_numbers = #tpu.dot_dimension_numbers<[1], [0], [0], [1], [0, 0, 1, 1], [], []>} : vector<8x64xbf16>, vector<64x512xbf16>, vector<8x512xf32> -> vector<8x512xf32>
    %23 = arith.addf %15, %22 : vector<8x512xf32>
    %24 = arith.addf %6, %8 : vector<8x64xf32>
    %cst_14 = arith.constant 0.020833334 : f32
    %25 = vector.broadcast %cst_14 : f32 to vector<8x64xf32>
    %26 = arith.mulf %24, %25 : vector<8x64xf32>
    %27 = arith.truncf %26 : vector<8x64xf32> to vector<8x64xbf16>
    %c2 = arith.constant 2 : index
    %c0_15 = arith.constant 0 : index
    %c0_16 = arith.constant 0 : index
    %28 = vector.load %arg2[%c2, %c0_15, %c0_16] : memref<3x64x512xbf16, #tpu.memory_space<vmem>>, vector<1x64x512xbf16>
    %29 = vector.shape_cast %28 : vector<1x64x512xbf16> to vector<64x512xbf16>
    %cst_17 = arith.constant dense<0.000000e+00> : vector<8x512xf32>
    %30 = tpu.matmul %27, %29, %cst_17 {dimension_numbers = #tpu.dot_dimension_numbers<[1], [0], [0], [1], [0, 0, 1, 1], [], []>} : vector<8x64xbf16>, vector<64x512xbf16>, vector<8x512xf32> -> vector<8x512xf32>
    %31 = arith.addf %23, %30 : vector<8x512xf32>
    %c0_18 = arith.constant 0 : index
    %c0_19 = arith.constant 0 : index
    %32 = vector.load %arg3[%c0_18, %c0_19] : memref<1x512xf32, #tpu.memory_space<vmem>>, vector<1x512xf32>
    %33 = vector.broadcast %32 : vector<1x512xf32> to vector<8x512xf32>
    %34 = arith.addf %31, %33 : vector<8x512xf32>
    %cst_20 = arith.constant 0.000000e+00 : f32
    %35 = vector.broadcast %cst_20 : f32 to vector<8x512xf32>
    %36 = arith.maximumf %34, %35 : vector<8x512xf32>
    %37 = arith.truncf %36 : vector<8x512xf32> to vector<8x512xbf16>
    %c0_21 = arith.constant 0 : index
    %c0_22 = arith.constant 0 : index
    %38 = vector.load %arg4[%c0_21, %c0_22] : memref<512x256xbf16, #tpu.memory_space<vmem>>, vector<512x256xbf16>
    %cst_23 = arith.constant dense<0.000000e+00> : vector<8x256xf32>
    %39 = tpu.matmul %37, %38, %cst_23 {dimension_numbers = #tpu.dot_dimension_numbers<[1], [0], [0], [1], [0, 0, 1, 1], [], []>} : vector<8x512xbf16>, vector<512x256xbf16>, vector<8x256xf32> -> vector<8x256xf32>
    %c0_24 = arith.constant 0 : index
    %c0_25 = arith.constant 0 : index
    %40 = vector.load %arg5[%c0_24, %c0_25] : memref<1x256xf32, #tpu.memory_space<vmem>>, vector<1x256xf32>
    %41 = vector.broadcast %40 : vector<1x256xf32> to vector<8x256xf32>
    %42 = arith.addf %39, %41 : vector<8x256xf32>
    %cst_26 = arith.constant 0.000000e+00 : f32
    %43 = vector.broadcast %cst_26 : f32 to vector<8x256xf32>
    %44 = arith.maximumf %42, %43 : vector<8x256xf32>
    %c0_27 = arith.constant 0 : index
    %c0_28 = arith.constant 0 : index
    %45 = vector.load %arg6[%c0_27, %c0_28] : memref<256x128xf32, #tpu.memory_space<vmem>>, vector<256x128xf32>
    %cst_29 = arith.constant dense<0.000000e+00> : vector<8x128xf32>
    %46 = tpu.matmul %44, %45, %cst_29 {dimension_numbers = #tpu.dot_dimension_numbers<[1], [0], [0], [1], [0, 0, 1, 1], [], []>} : vector<8x256xf32>, vector<256x128xf32>, vector<8x128xf32> -> vector<8x128xf32>
    %c0_30 = arith.constant 0 : index
    %c0_31 = arith.constant 0 : index
    %47 = vector.load %arg7[%c0_30, %c0_31] : memref<1x128xf32, #tpu.memory_space<vmem>>, vector<1x128xf32>
    %48 = vector.broadcast %47 : vector<1x128xf32> to vector<8x128xf32>
    %49 = arith.addf %46, %48 : vector<8x128xf32>
    %c0_32 = arith.constant 0 : index
    %c0_33 = arith.constant 0 : index
    %50 = vector.load %arg8[%c0_32, %c0_33] : memref<128x128xf32, #tpu.memory_space<vmem>>, vector<128x128xf32>
    %cst_34 = arith.constant dense<0.000000e+00> : vector<8x128xf32>
    %51 = tpu.matmul %49, %50, %cst_34 {dimension_numbers = #tpu.dot_dimension_numbers<[1], [0], [0], [1], [0, 0, 1, 1], [], []>} : vector<8x128xf32>, vector<128x128xf32>, vector<8x128xf32> -> vector<8x128xf32>
    %c0_35 = arith.constant 0 : index
    %c0_36 = arith.constant 0 : index
    %52 = vector.load %arg9[%c0_35, %c0_36] : memref<1x128xf32, #tpu.memory_space<vmem>>, vector<1x128xf32>
    %53 = vector.broadcast %52 : vector<1x128xf32> to vector<8x128xf32>
    %54 = arith.addf %51, %53 : vector<8x128xf32>
    %c0_37 = arith.constant 0 : index
    %c0_38 = arith.constant 0 : index
    %55 = vector.load %arg10[%c0_37, %c0_38] : memref<8x128xf32, #tpu.memory_space<vmem>>, vector<8x128xf32>
    tpu.vector_store %arg10[%c0_37, %c0_38], %54 {strides = array<i32>} : memref<8x128xf32, #tpu.memory_space<vmem>>, vector<8x128xf32>,
    return
  }
  func.func @transform_0(%arg0: i32) -> (i32, i32, i32) {
    %c0_i32 = arith.constant 0 : i32
    %c0_i32_0 = arith.constant 0 : i32
    %c0_i32_1 = arith.constant 0 : i32
    return %arg0, %c0_i32, %c0_i32_0 : i32, i32, i32
  }
  func.func @transform_1(%arg0: i32) -> (i32, i32, i32) {
    %c0_i32 = arith.constant 0 : i32
    %c0_i32_0 = arith.constant 0 : i32
    %c0_i32_1 = arith.constant 0 : i32
    %c0_i32_2 = arith.constant 0 : i32
    return %c0_i32, %c0_i32_0, %c0_i32_1 : i32, i32, i32
  }
  func.func @transform_2(%arg0: i32) -> (i32, i32) {
    %c0_i32 = arith.constant 0 : i32
    %c0_i32_0 = arith.constant 0 : i32
    %c0_i32_1 = arith.constant 0 : i32
    return %c0_i32, %c0_i32_0 : i32, i32
  }
  func.func @transform_3(%arg0: i32) -> (i32, i32) {
    %c0_i32 = arith.constant 0 : i32
    %c0_i32_0 = arith.constant 0 : i32
    %c0_i32_1 = arith.constant 0 : i32
    return %c0_i32, %c0_i32_0 : i32, i32
  }
  func.func @transform_4(%arg0: i32) -> (i32, i32) {
    %c0_i32 = arith.constant 0 : i32
    %c0_i32_0 = arith.constant 0 : i32
    %c0_i32_1 = arith.constant 0 : i32
    return %c0_i32, %c0_i32_0 : i32, i32
  }
  func.func @transform_5(%arg0: i32) -> (i32, i32) {
    %c0_i32 = arith.constant 0 : i32
    %c0_i32_0 = arith.constant 0 : i32
    %c0_i32_1 = arith.constant 0 : i32
    return %c0_i32, %c0_i32_0 : i32, i32
  }
  func.func @transform_6(%arg0: i32) -> (i32, i32) {
    %c0_i32 = arith.constant 0 : i32
    %c0_i32_0 = arith.constant 0 : i32
    %c0_i32_1 = arith.constant 0 : i32
    return %c0_i32, %c0_i32_0 : i32, i32
  }
  func.func @transform_7(%arg0: i32) -> (i32, i32) {
    %c0_i32 = arith.constant 0 : i32
    %c0_i32_0 = arith.constant 0 : i32
    %c0_i32_1 = arith.constant 0 : i32
    return %c0_i32, %c0_i32_0 : i32, i32
  }
  func.func @transform_8(%arg0: i32) -> (i32, i32) {
    %c0_i32 = arith.constant 0 : i32
    %c0_i32_0 = arith.constant 0 : i32
    %c0_i32_1 = arith.constant 0 : i32
    return %c0_i32, %c0_i32_0 : i32, i32
  }
  func.func @transform_9(%arg0: i32) -> (i32, i32) {
    %c0_i32 = arith.constant 0 : i32
    %c0_i32_0 = arith.constant 0 : i32
    return %arg0, %c0_i32 : i32, i32
  }
}

</mosaic_0001>

<bundles_post_ra>
// kernel: tpu_custom_call.1
= control target key start
LH: loop header
LB: loop body
LE: loop exit
PB: predicated region body
PF: predicated region fallthrough
CT: control target
= control target key end

     0   :  { %14 = vsyncpa [#allocation3], 0  ;;  %s3584_s0 = inlined_call_operand.vmem [shape: f32[8,96,64], index: 0, kind: input, shape index: {}]   ;;  %s3585_s1 = inlined_call_operand.vmem [shape: bf16[3,64,512], index: 1, kind: input, shape index: {}]   ;;  %s3586_s2 = inlined_call_operand.hbm [shape: f32[1,512], index: 2, kind: input, shape index: {}]   ;;  %s3587_s3 = inlined_call_operand.vmem [shape: bf16[512,256], index: 3, kind: input, shape index: {}]   ;;  %s3588_s4 = inlined_call_operand.vmem [shape: f32[1,256], index: 4, kind: input, shape index: {}]   ;;  %s3589_s5 = inlined_call_operand.vmem [shape: f32[256,128], index: 5, kind: input, shape index: {}]   ;;  %s3590_s6 = inlined_call_operand.vmem [shape: f32[1,128], index: 6, kind: input, shape index: {}]   ;;  %s3591_s7 = inlined_call_operand.vmem [shape: f32[128,128], index: 7, kind: input, shape index: {}]   ;;  %s3592_s8 = inlined_call_operand.vmem [shape: f32[1,128], index: 8, kind: input, shape index: {}]   ;;  %s3593_s9 = inlined_call_operand.hbm [shape: f32[8,128], index: 9, kind: output, shape index: {}]  }
   0x1   :  { %15 = vsyncpa [#allocation4], 0  ;;  %s2450_s30 = smov [#allocation2]   ;;  %s2402_s13 = scalar_lea.hbm %s3586_s2, 64 }
   0x2   :  { %s26_s10 = sshll.u32 %s2450_s30, 4  ;;  %p2403_p0 = scmp.ne.s32.totalorder %s3586_s2, %s2402_s13  ;;  %s27_s10 = int_to_ptr.vmem [resolvable:$true] %s26_s10 }
   0x3   :  { %p2406_p1 = scmp.lt.u32.totalorder %s2402_s13, %s3586_s2 }
   0x5   :  { %p2408_p2 = pnand %p2406_p1, %p2403_p0 }
   0x7   :  { %2411 = shalt.err (!%p2408_p2)
}
   0x8   :  { %s2412_s18 = scalar_lea.vmem %s27_s10, 64  ;;  %p2417_p4 = scmp.lt.s32.totalorder %s27_s10, %s27_s10 }
   0x9   :  { %p2413_p3 = scmp.ne.s32.totalorder %s27_s10, %s2412_s18  ;;  %p2418_p5 = scmp.lt.s32.totalorder %s2412_s18, %s2412_s18 }
   0xb   :  { %p2419_p6 = por %p2418_p5, %p2417_p4 }
   0xd   :  { %p2420_p7 = pnand %p2419_p6, %p2413_p3 }
   0xf   :  { %2423 = shalt.err (!%p2420_p7)
}
  0x10   :  { %29 = dma.hbm_to_vmem [thread:$0]  %s3586_s2, 64, %s27_s10, [#allocation3]  }
  0x11   :  { %2446 = dma.done.wait [#allocation3], 64  }
  0x12   :  { %2447 = vsyncadd [#allocation3], 4294967232  ;;  %v2451_v0 = vmov 0   ;;  %v2234_v1 = vld [vmem:[%s3585_s1 + $0x84] ss:$16 sps:$4 sm:$0xff]   ;;  %vm142_vm0 = vcmask 523264  }
  0x13   :  { %722 = vmatprep.mubr.bf16.mxu1 %v2451_v0  ;;  %1141 = vmatprep.mubr.bf16.mxu0 %v2451_v0  ;;  %v2236_v2 = vld [vmem:[%s3585_s1 + $0x80] ss:$16 sps:$4 sm:$0xff]   ;;  %v2237_v3 = vld [vmem:[%s3585_s1 + $0xa4] ss:$16 sps:$4 sm:$0xff]   ;;  %v47_v9 = vld [vmem:[%s3584_s0 + $0x8] sm:$0xff]  ;;  %vm592_vm1 = vcmask 1041409  }
  0x14   :  { %690 = vmatprep.subr.bf16.mxu1 %v2234_v1  ;;  %v2239_v4 = vld [vmem:[%s3585_s1 + $0xa0] ss:$16 sps:$4 sm:$0xff]   ;;  %v2240_v5 = vld [vmem:[%s3585_s1 + $0xc4] ss:$16 sps:$4 sm:$0xff]   ;;  %v49_v11 = vld [vmem:[%s3584_s0 + $0x18] sm:$0xff]  ;;  %v144_v16 = vsel %vm142_vm0, %v47_v9, 0.0 }
  0x15   :  { %691 = vmatpush1.bf16.msra.mxu1 %v2236_v2  ;;  %v2242_v6 = vld [vmem:[%s3585_s1 + $0xc0] ss:$16 sps:$4 sm:$0xff]   ;;  %v2243_v7 = vld [vmem:[%s3585_s1 + $0xe4] ss:$16 sps:$4 sm:$0xff]   ;;  %v51_v14 = vld [vmem:[%s3584_s0 + $0x28] sm:$0xff]  ;;  %v231_v18 = vsel %vm142_vm0, %v49_v11, 0.0 }
  0x16   :  { %692 = vmatprep.subr.bf16.mxu1 %v2237_v3  ;;  %v46_v8 = vld [vmem:[%s3584_s0] sm:$0xff]  ;;  %v48_v10 = vld [vmem:[%s3584_s0 + $0x10] sm:$0xff]  ;;  %v53_v20 = vld [vmem:[%s3584_s0 + $0x38] sm:$0xff]  ;;  %v234_v25 = vsel %vm142_vm0, %v51_v14, 0.0  ;;  %vm594_vm2 = vcmask 1042434   ;;  %vm596_vm3 = vcmask 1043459  }
  0x17   :  { %v143_v12 = vsel %vm142_vm0, %v46_v8, 0.0  ;;  %v50_v13 = vld [vmem:[%s3584_s0 + $0x20] sm:$0xff]  ;;  %v52_v15 = vld [vmem:[%s3584_s0 + $0x30] sm:$0xff]  ;;  %v146_v17 = vsel %vm142_vm0, %v48_v10, 0.0  ;;  %v59_v27 = vld [vmem:[%s3584_s0 + $0x68] sm:$0xff]  ;;  %v320_v32 = vsel %vm142_vm0, %v53_v20, 0.0 }
  0x18   :  { %v2245_v19 = vld [vmem:[%s3585_s1 + $0xe0] ss:$16 sps:$4 sm:$0xff]   ;;  %v145_v23 = vadd.f32 %v144_v16, %v143_v12  ;;  %v232_v24 = vsel %vm142_vm0, %v50_v13, 0.0  ;;  %v319_v26 = vsel %vm142_vm0, %v52_v15, 0.0  ;;  %v61_v29 = vld [vmem:[%s3584_s0 + $0x78] sm:$0xff]  ;;  %v63_v35 = vld [vmem:[%s3584_s0 + $0x88] sm:$0xff] }
  0x19   :  { %693 = vmatpush1.bf16.msra.mxu1 %v2239_v4  ;;  %v54_v21 = vld [vmem:[%s3584_s0 + $0x40] sm:$0xff]  ;;  %v60_v28 = vld [vmem:[%s3584_s0 + $0x70] sm:$0xff]  ;;  %v233_v31 = vadd.f32 %v232_v24, %v231_v18  ;;  %v155_v37 = vsel %vm142_vm0, %v59_v27, 0.0  ;;  %v242_v39 = vsel %vm142_vm0, %v61_v29, 0.0  ;;  %v2248_v40 = vld [vmem:[%s3585_s1 + $0x8c] ss:$16 sps:$4 sm:$0xff]   ;;  %v2622_v52 = vadd.f32 %v320_v32, %v319_v26 }
  0x1a   :  { %694 = vmatprep.subr.bf16.mxu1 %v2240_v5  ;;  %v58_v22 = vld [vmem:[%s3584_s0 + $0x60] sm:$0xff]  ;;  %v2593_v33 = vsel %vm142_vm0, %v54_v21, 0.0  ;;  %v147_v36 = vadd.f32 %v146_v17, %v145_v23  ;;  %v157_v38 = vsel %vm142_vm0, %v60_v28, 0.0  ;;  %v245_v45 = vsel %vm142_vm0, %v63_v35, 0.0  ;;  %v71_v46 = vld [vmem:[%s3584_s0 + $0xc8] sm:$0xff]  ;;  %v72_v47 = vld [vmem:[%s3584_s0 + $0xd0] sm:$0xff] }
  0x1b   :  { %v154_v30 = vsel %vm142_vm0, %v58_v22, 0.0  ;;  %v62_v34 = vld [vmem:[%s3584_s0 + $0x80] sm:$0xff]  ;;  %v235_v43 = vadd.f32 %v234_v25, %v233_v31  ;;  %v73_v48 = vld [vmem:[%s3584_s0 + $0xd8] sm:$0xff]  ;;  %v166_v55 = vsel %vm142_vm0, %v71_v46, 0.0  ;;  %v168_v56 = vsel %vm142_vm0, %v72_v47, 0.0  ;;  %v83_v63 = vld [vmem:[%s3584_s0 + $0x128] sm:$0xff] }
  0x1c   :  { %v70_v41 = vld [vmem:[%s3584_s0 + $0xc0] sm:$0xff]  ;;  %v156_v42 = vadd.f32 %v155_v37, %v154_v30  ;;  %v243_v44 = vsel %vm142_vm0, %v62_v34, 0.0  ;;  %v148_v49 = vrot.slane %v147_v36, 4  ;;  %v253_v62 = vsel %vm142_vm0, %v73_v48, 0.0  ;;  %v84_v1 = vld [vmem:[%s3584_s0 + $0x130] sm:$0xff]  ;;  %v95_v15 = vld [vmem:[%s3584_s0 + $0x188] sm:$0xff] }
  0x1d   :  { %695 = vmatpush1.bf16.msra.mxu1 %v2242_v6  ;;  %v165_v50 = vsel %vm142_vm0, %v70_v41, 0.0  ;;  %v244_v51 = vadd.f32 %v243_v44, %v242_v39  ;;  %v74_v53 = vld [vmem:[%s3584_s0 + $0xe0] sm:$0xff]  ;;  %v236_v57 = vrot.slane %v235_v43, 4  ;;  %v177_v8 = vsel %vm142_vm0, %v83_v63, 0.0  ;;  %v96_v16 = vld [vmem:[%s3584_s0 + $0x190] sm:$0xff]  ;;  %v107_v30 = vld [vmem:[%s3584_s0 + $0x1e8] sm:$0xff] }
  0x1e   :  { %696 = vmatprep.subr.bf16.mxu1 %v2243_v7  ;;  %v158_v54 = vadd.f32 %v157_v38, %v156_v42  ;;  %v82_v58 = vld [vmem:[%s3584_s0 + $0x120] sm:$0xff]  ;;  %v149_v59 = vadd.f32 %v148_v49, %v147_v36  ;;  %v167_v60 = vadd.f32 %v166_v55, %v165_v50  ;;  %v254_v5 = vsel %vm142_vm0, %v74_v53, 0.0  ;;  %v108_v31 = vld [vmem:[%s3584_s0 + $0x1f0] sm:$0xff]  ;;  %v119_v46 = vld [vmem:[%s3584_s0 + $0x248] sm:$0xff]  ;;  %s2455_s27 = smov [#allocation5]  }
  0x1f   :  { %v246_v61 = vadd.f32 %v245_v45, %v244_v51  ;;  %v176_v3 = vsel %vm142_vm0, %v82_v58, 0.0  ;;  %v237_v4 = vadd.f32 %v236_v57, %v235_v43  ;;  %v179_v9 = vsel %vm142_vm0, %v84_v1, 0.0  ;;  %v94_v10 = vld [vmem:[%s3584_s0 + $0x180] sm:$0xff]  ;;  %v120_v47 = vld [vmem:[%s3584_s0 + $0x250] sm:$0xff]  ;;  %v131_v63 = vld [vmem:[%s3584_s0 + $0x2a8] sm:$0xff] }
  0x20   :  { %v159_v2 = vrot.slane %v158_v54, 4  ;;  %v150_v6 = vrot.slane %v149_v59, 2  ;;  %v169_v7 = vadd.f32 %v168_v56, %v167_v60  ;;  %v178_v12 = vadd.f32 %v177_v8, %v176_v3  ;;  %v106_v25 = vld [vmem:[%s3584_s0 + $0x1e0] sm:$0xff]  ;;  %v132_v1 = vld [vmem:[%s3584_s0 + $0x2b0] sm:$0xff] }
  0x21   :  { %697 = vmatpush1.bf16.msra.mxu1 %v2245_v19  ;;  %v238_v13 = vrot.slane %v237_v4, 2  ;;  %v247_v14 = vrot.slane %v246_v61, 4  ;;  %v187_v19 = vsel %vm142_vm0, %v94_v10, 0.0  ;;  %v2653_v20 = vadd.f32 %v254_v5, %v253_v62  ;;  %v118_v41 = vld [vmem:[%s3584_s0 + $0x240] sm:$0xff]  ;;  %v75_v62 = vld [vmem:[%s3584_s0 + $0xe8] sm:$0xff]  ;;  %v85_v10 = vld [vmem:[%s3584_s0 + $0x138] sm:$0xff] }
  0x22   :  { %731 = vmatprep.subr.bf16.mxu1 %v2248_v40  ;;  %v160_v11 = vadd.f32 %v159_v2, %v158_v54  ;;  %v151_v17 = vadd.f32 %v150_v6, %v149_v59  ;;  %v170_v18 = vrot.slane %v169_v7, 4  ;;  %v180_v22 = vadd.f32 %v179_v9, %v178_v12  ;;  %v130_v57 = vld [vmem:[%s3584_s0 + $0x2a0] sm:$0xff] }
  0x23   :  { %v188_v23 = vsel %vm142_vm0, %v95_v15, 0.0  ;;  %v190_v24 = vsel %vm142_vm0, %v96_v16, 0.0  ;;  %v239_v29 = vadd.f32 %v238_v13, %v237_v4  ;;  %v198_v35 = vsel %vm142_vm0, %v106_v25, 0.0  ;;  %v86_v15 = vld [vmem:[%s3584_s0 + $0x140] sm:$0xff]  ;;  %v87_v25 = vld [vmem:[%s3584_s0 + $0x148] sm:$0xff] }
  0x24   :  { %v161_v21 = vrot.slane %v160_v11, 2  ;;  %v152_v26 = vrot.slane %v151_v17, 1  ;;  %v171_v27 = vadd.f32 %v170_v18, %v169_v7  ;;  %v189_v28 = vadd.f32 %v188_v23, %v187_v19 }
  0x25   :  { %v181_v34 = vrot.slane %v180_v22, 4  ;;  %v248_v36 = vadd.f32 %v247_v14, %v246_v61  ;;  %v199_v40 = vsel %vm142_vm0, %v107_v30, 0.0  ;;  %v201_v45 = vsel %vm142_vm0, %v108_v31, 0.0 }
  0x26   :  { %v162_v32 = vadd.f32 %v161_v21, %v160_v11  ;;  %v2667_v37 = vadd.f32 %v152_v26, %v151_v17  ;;  %v172_v38 = vrot.slane %v171_v27, 2  ;;  %v191_v39 = vadd.f32 %v190_v24, %v189_v28  ;;  %v97_v26 = vld [vmem:[%s3584_s0 + $0x198] sm:$0xff] }
  0x27   :  { %v182_v43 = vadd.f32 %v181_v34, %v180_v22  ;;  %v200_v44 = vadd.f32 %v199_v40, %v198_v35  ;;  %v209_v50 = vsel %vm142_vm0, %v118_v41, 0.0  ;;  %v240_v51 = vrot.slane %v239_v29, 1  ;;  %v110_v40 = vld [vmem:[%s3584_s0 + $0x200] sm:$0xff] }
  0x28   :  { %v163_v42 = vrot.slane %v162_v32, 1  ;;  %v173_v48 = vadd.f32 %v172_v38, %v171_v27  ;;  %v192_v49 = vrot.slane %v191_v39, 4  ;;  %v210_v56 = vsel %vm142_vm0, %v119_v46, 0.0  ;;  %v98_v27 = vld [vmem:[%s3584_s0 + $0x1a0] sm:$0xff]  ;;  %v99_v38 = vld [vmem:[%s3584_s0 + $0x1a8] sm:$0xff] }
  0x29   :  { %v183_v54 = vrot.slane %v182_v43, 2  ;;  %v202_v55 = vadd.f32 %v201_v45, %v200_v44  ;;  %v211_v60 = vadd.f32 %v210_v56, %v209_v50  ;;  %v212_v61 = vsel %vm142_vm0, %v120_v47, 0.0  ;;  %v121_v50 = vld [vmem:[%s3584_s0 + $0x258] sm:$0xff] }
  0x2a   :  { %v2681_v53 = vadd.f32 %v163_v42, %v162_v32  ;;  %v174_v58 = vrot.slane %v173_v48, 1  ;;  %v193_v59 = vadd.f32 %v192_v49, %v191_v39  ;;  %v220_v4 = vsel %vm142_vm0, %v130_v57, 0.0  ;;  %v109_v39 = vld [vmem:[%s3584_s0 + $0x1f8] sm:$0xff]  ;;  %v111_v49 = vld [vmem:[%s3584_s0 + $0x208] sm:$0xff]  ;;  %v122_v57 = vld [vmem:[%s3584_s0 + $0x260] sm:$0xff] }
  0x2b   :  { %v184_v2 = vadd.f32 %v183_v54, %v182_v43  ;;  %v203_v3 = vrot.slane %v202_v55, 4  ;;  %v2698_v5 = vadd.f32 %v240_v51, %v239_v29  ;;  %v213_v8 = vadd.f32 %v212_v61, %v211_v60 }
  0x2c   :  { %v2700_v6 = vadd.f32 %v174_v58, %v173_v48  ;;  %v194_v7 = vrot.slane %v193_v59, 2  ;;  %v221_v9 = vsel %vm142_vm0, %v131_v63, 0.0  ;;  %v223_v14 = vsel %vm142_vm0, %v132_v1, 0.0  ;;  %v2258_v48 = vld [vmem:[%s3585_s1 + $0x104] ss:$16 sps:$4 sm:$0xff]   ;;  %v123_v63 = vld [vmem:[%s3584_s0 + $0x268] sm:$0xff] }
  0x2d   :  { %v185_v11 = vrot.slane %v184_v2, 1  ;;  %v204_v12 = vadd.f32 %v203_v3, %v202_v55  ;;  %v222_v13 = vadd.f32 %v221_v9, %v220_v4  ;;  %v214_v17 = vrot.slane %v213_v8, 4  ;;  %1109 = vmatprep.subr.bf16.mxu0 %v2258_v48  ;;  %v2276_v48 = vld [vmem:[%s3585_s1 + $0x164] ss:$16 sps:$4 sm:$0xff]  }
  0x2e   :  { %v195_v16 = vadd.f32 %v194_v7, %v193_v59  ;;  %v249_v18 = vrot.slane %v248_v36, 2  ;;  %v256_v19 = vsel %vm142_vm0, %v75_v62, 0.0  ;;  %v264_v31 = vsel %vm142_vm0, %v85_v10, 0.0  ;;  %v2263_v62 = vld [vmem:[%s3585_s1 + $0x100] ss:$16 sps:$4 sm:$0xff]  }
  0x2f   :  { %v2711_v21 = vadd.f32 %v185_v11, %v184_v2  ;;  %v205_v22 = vrot.slane %v204_v12, 2  ;;  %v224_v23 = vadd.f32 %v223_v14, %v222_v13  ;;  %v257_v24 = vadd.f32 %v256_v19, %v2653_v20  ;;  %v2264_v7 = vld [vmem:[%s3585_s1 + $0x124] ss:$16 sps:$4 sm:$0xff]   ;;  %1110 = vmatpush1.bf16.msra.mxu0 %v2263_v62  ;;  %v135_v14 = vld [vmem:[%s3584_s0 + $0x2c8] sm:$0xff]  ;;  %v2269_v19 = vld [vmem:[%s3585_s1 + $0x120] ss:$16 sps:$4 sm:$0xff]  }
  0x30   :  { %v196_v28 = vrot.slane %v195_v16, 1  ;;  %v215_v29 = vadd.f32 %v214_v17, %v213_v8  ;;  %v250_v30 = vadd.f32 %v249_v18, %v248_v36  ;;  %v265_v35 = vsel %vm142_vm0, %v86_v15, 0.0  ;;  %v133_v8 = vld [vmem:[%s3584_s0 + $0x2b8] sm:$0xff]  ;;  %v134_v13 = vld [vmem:[%s3584_s0 + $0x2c0] sm:$0xff]  ;;  %1111 = vmatprep.subr.bf16.mxu0 %v2264_v7 }
  0x31   :  { %v206_v32 = vadd.f32 %v205_v22, %v204_v12  ;;  %v225_v34 = vrot.slane %v224_v23, 4  ;;  %v258_v20 = vrot.slane %v257_v24, 4  ;;  %v266_v43 = vadd.f32 %v265_v35, %v264_v31  ;;  %v64_v31 = vld [vmem:[%s3584_s0 + $0x90] sm:$0xff]  ;;  %v77_v62 = vld [vmem:[%s3584_s0 + $0xf8] sm:$0xff] }
  0x32   :  { %v2734_v36 = vadd.f32 %v196_v28, %v195_v16  ;;  %v216_v41 = vrot.slane %v215_v29, 2  ;;  %v251_v42 = vrot.slane %v250_v30, 1  ;;  %v267_v47 = vsel %vm142_vm0, %v87_v25, 0.0 }
  0x33   :  { %v207_v44 = vrot.slane %v206_v32, 1  ;;  %v226_v45 = vadd.f32 %v225_v34, %v224_v23  ;;  %v259_v46 = vadd.f32 %v258_v20, %v257_v24  ;;  %v268_v55 = vadd.f32 %v267_v47, %v266_v43  ;;  %1112 = vmatpush1.bf16.msra.mxu0 %v2269_v19  ;;  %v2275_v43 = vld [vmem:[%s3585_s1 + $0x140] ss:$16 sps:$4 sm:$0xff]  }
  0x34   :  { %v217_v51 = vadd.f32 %v216_v41, %v215_v29  ;;  %v2746_v54 = vadd.f32 %v251_v42, %v250_v30  ;;  %v275_v56 = vsel %vm142_vm0, %v97_v26, 0.0  ;;  %v276_v61 = vsel %vm142_vm0, %v98_v27, 0.0  ;;  %v2270_v30 = vld [vmem:[%s3585_s1 + $0x144] ss:$16 sps:$4 sm:$0xff]  }
  0x35   :  { %v2752_v58 = vadd.f32 %v207_v44, %v206_v32  ;;  %v227_v59 = vrot.slane %v226_v45, 2  ;;  %v260_v60 = vrot.slane %v259_v46, 2  ;;  %v269_v2 = vrot.slane %v268_v55, 4  ;;  %v65_v32 = vld [vmem:[%s3584_s0 + $0x98] sm:$0xff]  ;;  %1113 = vmatprep.subr.bf16.mxu0 %v2270_v30 }
  0x36   :  { %v218_v1 = vrot.slane %v217_v51, 1  ;;  %v277_v3 = vadd.f32 %v276_v61, %v275_v56  ;;  %v278_v4 = vsel %vm142_vm0, %v99_v38, 0.0  ;;  %v286_v11 = vsel %vm142_vm0, %v109_v39, 0.0  ;;  %v2281_v61 = vld [vmem:[%s3585_s1 + $0x160] ss:$16 sps:$4 sm:$0xff]  }
  0x37   :  { %v228_v9 = vadd.f32 %v227_v59, %v226_v45  ;;  %v261_v10 = vadd.f32 %v260_v60, %v259_v46  ;;  %v287_v12 = vsel %vm142_vm0, %v110_v40, 0.0  ;;  %v270_v16 = vadd.f32 %v269_v2, %v268_v55  ;;  %1114 = vmatpush1.bf16.msra.mxu0 %v2275_v43  ;;  %v102_v43 = vld [vmem:[%s3584_s0 + $0x1c0] sm:$0xff] }
  0x38   :  { %v2776_v15 = vadd.f32 %v218_v1, %v217_v51  ;;  %v279_v17 = vadd.f32 %v278_v4, %v277_v3  ;;  %v288_v18 = vadd.f32 %v287_v12, %v286_v11  ;;  %v289_v24 = vsel %vm142_vm0, %v111_v49, 0.0  ;;  %v66_v49 = vld [vmem:[%s3584_s0 + $0xa0] sm:$0xff]  ;;  %1115 = vmatprep.subr.bf16.mxu0 %v2276_v48  ;;  %v112_v48 = vld [vmem:[%s3584_s0 + $0x210] sm:$0xff] }
  0x39   :  { %v229_v22 = vrot.slane %v228_v9, 1  ;;  %v262_v23 = vrot.slane %v261_v10, 1  ;;  %v297_v25 = vsel %vm142_vm0, %v121_v50, 0.0  ;;  %v271_v26 = vrot.slane %v270_v16, 2  ;;  %v76_v50 = vld [vmem:[%s3584_s0 + $0xf0] sm:$0xff] }
  0x3a   :  { %v280_v27 = vrot.slane %v279_v17, 4  ;;  %v290_v28 = vadd.f32 %v289_v24, %v288_v18  ;;  %v298_v29 = vsel %vm142_vm0, %v122_v57, 0.0  ;;  %v300_v38 = vsel %vm142_vm0, %v123_v63, 0.0 }
  0x3b   :  { %v2793_v34 = vadd.f32 %v229_v22, %v228_v9  ;;  %v2795_v20 = vadd.f32 %v262_v23, %v261_v10  ;;  %v299_v35 = vadd.f32 %v298_v29, %v297_v25  ;;  %v272_v39 = vadd.f32 %v271_v26, %v270_v16  ;;  %v78_v10 = vld [vmem:[%s3584_s0 + $0x100] sm:$0xff]  ;;  %v88_v16 = vld [vmem:[%s3584_s0 + $0x150] sm:$0xff]  ;;  %1116 = vmatpush1.bf16.msra.mxu0 %v2281_v61  ;;  %v89_v23 = vld [vmem:[%s3584_s0 + $0x158] sm:$0xff] }
  0x3c   :  { %v281_v40 = vadd.f32 %v280_v27, %v279_v17  ;;  %v291_v41 = vrot.slane %v290_v28, 4  ;;  %v308_v42 = vsel %vm142_vm0, %v133_v8, 0.0  ;;  %v309_v45 = vsel %vm142_vm0, %v134_v13, 0.0  ;;  %v124_v61 = vld [vmem:[%s3584_s0 + $0x270] sm:$0xff] }
  0x3d   :  { %v301_v44 = vadd.f32 %v300_v38, %v299_v35  ;;  %v311_v46 = vsel %vm142_vm0, %v135_v14, 0.0  ;;  %v323_v47 = vadd.f32 %v2593_v33, %v2622_v52  ;;  %v273_v51 = vrot.slane %v272_v39, 1  ;;  %v100_v35 = vld [vmem:[%s3584_s0 + $0x1b0] sm:$0xff] }
  0x3e   :  { %v282_v55 = vrot.slane %v281_v40, 2  ;;  %v292_v56 = vadd.f32 %v291_v41, %v290_v28  ;;  %v310_v57 = vadd.f32 %v309_v45, %v308_v42  ;;  %v330_v33 = vsel %vm142_vm0, %v64_v31, 0.0  ;;  %v90_v28 = vld [vmem:[%s3584_s0 + $0x160] sm:$0xff]  ;;  %v101_v42 = vld [vmem:[%s3584_s0 + $0x1b8] sm:$0xff] }
  0x3f   :  { %v302_v59 = vrot.slane %v301_v44, 4  ;;  %v324_v60 = vrot.slane %v323_v47, 4  ;;  %v331_v52 = vsel %vm142_vm0, %v65_v32, 0.0  ;;  %v2823_v63 = vadd.f32 %v273_v51, %v272_v39 }
  0x40   :  { %v283_v1 = vadd.f32 %v282_v55, %v281_v40  ;;  %v293_v2 = vrot.slane %v292_v56, 2  ;;  %v312_v3 = vadd.f32 %v311_v46, %v310_v57  ;;  %v332_v8 = vadd.f32 %v331_v52, %v330_v33  ;;  %v114_v52 = vld [vmem:[%s3584_s0 + $0x220] sm:$0xff] }
  0x41   :  { %v303_v4 = vadd.f32 %v302_v59, %v301_v44  ;;  %v325_v7 = vadd.f32 %v324_v60, %v323_v47  ;;  %v333_v9 = vsel %vm142_vm0, %v66_v49, 0.0  ;;  %v341_v14 = vsel %vm142_vm0, %v76_v50, 0.0 }
  0x42   :  { %v284_v11 = vrot.slane %v283_v1, 1  ;;  %v294_v12 = vadd.f32 %v293_v2, %v292_v56  ;;  %v313_v13 = vrot.slane %v312_v3, 4  ;;  %v334_v19 = vadd.f32 %v333_v9, %v332_v8  ;;  %v113_v56 = vld [vmem:[%s3584_s0 + $0x218] sm:$0xff] }
  0x43   :  { %v304_v17 = vrot.slane %v303_v4, 2  ;;  %v326_v18 = vrot.slane %v325_v7, 2  ;;  %v342_v22 = vsel %vm142_vm0, %v77_v62, 0.0  ;;  %v344_v32 = vsel %vm142_vm0, %v78_v10, 0.0 }
  0x44   :  { %v2837_v24 = vadd.f32 %v284_v11, %v283_v1  ;;  %v295_v25 = vrot.slane %v294_v12, 1  ;;  %v314_v26 = vadd.f32 %v313_v13, %v312_v3  ;;  %v343_v27 = vadd.f32 %v342_v22, %v341_v14 }
  0x45   :  { %v305_v29 = vadd.f32 %v304_v17, %v303_v4  ;;  %v327_v30 = vadd.f32 %v326_v18, %v325_v7  ;;  %v335_v31 = vrot.slane %v334_v19, 4  ;;  %v352_v41 = vsel %vm142_vm0, %v88_v16, 0.0  ;;  %v125_v4 = vld [vmem:[%s3584_s0 + $0x278] sm:$0xff]  ;;  %v126_v16 = vld [vmem:[%s3584_s0 + $0x280] sm:$0xff]  ;;  %v136_v17 = vld [vmem:[%s3584_s0 + $0x2d0] sm:$0xff] }
  0x46   :  { %v2846_v38 = vadd.f32 %v295_v25, %v294_v12  ;;  %v315_v39 = vrot.slane %v314_v26, 2  ;;  %v345_v40 = vadd.f32 %v344_v32, %v343_v27  ;;  %v353_v47 = vsel %vm142_vm0, %v89_v23, 0.0  ;;  %v137_v25 = vld [vmem:[%s3584_s0 + $0x2d8] sm:$0xff] }
  0x47   :  { %v306_v44 = vrot.slane %v305_v29, 1  ;;  %v328_v45 = vrot.slane %v327_v30, 1  ;;  %v336_v46 = vadd.f32 %v335_v31, %v334_v19  ;;  %v354_v51 = vadd.f32 %v353_v47, %v352_v41 }
  0x48   :  { %v316_v49 = vadd.f32 %v315_v39, %v314_v26  ;;  %v346_v50 = vrot.slane %v345_v40, 4  ;;  %v355_v55 = vsel %vm142_vm0, %v90_v28, 0.0  ;;  %v363_v33 = vsel %vm142_vm0, %v100_v35, 0.0 }
  0x49   :  { %v2863_v57 = vadd.f32 %v306_v44, %v305_v29  ;;  %v2865_v59 = vadd.f32 %v328_v45, %v327_v30  ;;  %v337_v60 = vrot.slane %v336_v46, 2  ;;  %v356_v2 = vadd.f32 %v355_v55, %v354_v51  ;;  %v138_v30 = vld [vmem:[%s3584_s0 + $0x2e0] sm:$0xff] }
  0x4a   :  { %v317_v62 = vrot.slane %v316_v49, 1  ;;  %v347_v1 = vadd.f32 %v346_v50, %v345_v40  ;;  %v364_v3 = vsel %vm142_vm0, %v101_v42, 0.0  ;;  %v366_v9 = vsel %vm142_vm0, %v102_v43, 0.0 }
  0x4b   :  { %v338_v7 = vadd.f32 %v337_v60, %v336_v46  ;;  %v365_v8 = vadd.f32 %v364_v3, %v363_v33  ;;  %v374_v10 = vsel %vm142_vm0, %v112_v48, 0.0  ;;  %v357_v13 = vrot.slane %v356_v2, 4 }
  0x4c   :  { %v2880_v11 = vadd.f32 %v317_v62, %v316_v49  ;;  %v348_v12 = vrot.slane %v347_v1, 2  ;;  %v375_v14 = vsel %vm142_vm0, %v113_v56, 0.0  ;;  %v377_v23 = vsel %vm142_vm0, %v114_v52, 0.0 }
  0x4d   :  { %v339_v18 = vrot.slane %v338_v7, 1  ;;  %v367_v19 = vadd.f32 %v366_v9, %v365_v8  ;;  %v376_v22 = vadd.f32 %v375_v14, %v374_v10  ;;  %v358_v27 = vadd.f32 %v357_v13, %v356_v2 }
  0x4e   :  { %v349_v26 = vadd.f32 %v348_v12, %v347_v1  ;;  %v385_v28 = vsel %vm142_vm0, %v124_v61, 0.0  ;;  %v386_v29 = vsel %vm142_vm0, %v125_v4, 0.0  ;;  %v388_v42 = vsel %vm142_vm0, %v126_v16, 0.0 }
  0x4f   :  { %v2898_v31 = vadd.f32 %v339_v18, %v338_v7  ;;  %v368_v32 = vrot.slane %v367_v19, 4  ;;  %v378_v35 = vadd.f32 %v377_v23, %v376_v22  ;;  %v387_v39 = vadd.f32 %v386_v29, %v385_v28 }
  0x50   :  { %v350_v40 = vrot.slane %v349_v26, 1  ;;  %v359_v41 = vrot.slane %v358_v27, 2  ;;  %v396_v43 = vsel %vm142_vm0, %v136_v17, 0.0  ;;  %v397_v47 = vsel %vm142_vm0, %v137_v25, 0.0 }
  0x51   :  { %v369_v44 = vadd.f32 %v368_v32, %v367_v19  ;;  %v379_v45 = vrot.slane %v378_v35, 4  ;;  %v389_v46 = vadd.f32 %v388_v42, %v387_v39  ;;  %v398_v50 = vadd.f32 %v397_v47, %v396_v43 }
  0x52   :  { %v2903_v48 = vadd.f32 %v350_v40, %v349_v26  ;;  %v360_v49 = vadd.f32 %v359_v41, %v358_v27  ;;  %v399_v51 = vsel %vm142_vm0, %v138_v30, 0.0  ;;  %v2908_v33 = vadd.f32 %v2698_v5, %v2667_v37  ;;  %v2308_v37 = vld [vmem:[%s3587_s3 + $0x4] ss:$8 sps:$4 sm:$0xff]   ;;  %v57_v41 = vld [vmem:[%s3584_s0 + $0x58] sm:$0xff] }
  0x53   :  { %v370_v55 = vrot.slane %v369_v44, 2  ;;  %v380_v56 = vadd.f32 %v379_v45, %v378_v35  ;;  %v390_v60 = vrot.slane %v389_v46, 4  ;;  %v400_v61 = vadd.f32 %v399_v51, %v398_v50  ;;  %1625 = vmatprep.subr.bf16.mxu0 %v2308_v37  ;;  %v67_v50 = vld [vmem:[%s3584_s0 + $0xa8] sm:$0xff]  ;;  %v68_v51 = vld [vmem:[%s3584_s0 + $0xb0] sm:$0xff] }
  0x54   :  { %v361_v52 = vrot.slane %v360_v49, 1  ;;  %v2912_v62 = vadd.f32 %v2746_v54, %v2681_v53  ;;  %v2916_v1 = vadd.f32 %v2795_v20, %v2700_v6  ;;  %v2920_v7 = vadd.f32 %v2823_v63, %v2711_v21  ;;  %v79_v37 = vld [vmem:[%s3584_s0 + $0x108] sm:$0xff] }
  0x55   :  { %v371_v2 = vadd.f32 %v370_v55, %v369_v44  ;;  %v381_v3 = vrot.slane %v380_v56, 2  ;;  %v391_v4 = vadd.f32 %v390_v60, %v389_v46  ;;  %v401_v53 = vrot.slane %v400_v61, 4  ;;  %v69_v55 = vld [vmem:[%s3584_s0 + $0xb8] sm:$0xff] }
  0x56   :  { %v2925_v8 = vadd.f32 %v361_v52, %v360_v49  ;;  %v2929_v9 = vadd.f32 %v2837_v24, %v2734_v36  ;;  %v2933_v6 = vadd.f32 %v2846_v38, %v2752_v58  ;;  %v2937_v13 = vadd.f32 %v2863_v57, %v2776_v15 }
  0x57   :  { %v372_v10 = vrot.slane %v371_v2, 1  ;;  %v382_v21 = vadd.f32 %v381_v3, %v380_v56  ;;  %v392_v12 = vrot.slane %v391_v4, 2  ;;  %v402_v14 = vadd.f32 %v401_v53, %v400_v61  ;;  %v80_v53 = vld [vmem:[%s3584_s0 + $0x110] sm:$0xff] }
  0x58   :  { %v2941_v16 = vadd.f32 %v2880_v11, %v2793_v34  ;;  %v535_v36 = vadd.f32 %v2865_v59, %v2698_v5  ;;  %v536_v58 = vadd.f32 %v2898_v31, %v2746_v54  ;;  %vm598_vm4 = vcmask 1044484  }
  0x59   :  { %v2947_v17 = vadd.f32 %v372_v10, %v371_v2  ;;  %v383_v18 = vrot.slane %v382_v21, 1  ;;  %v393_v19 = vadd.f32 %v392_v12, %v391_v4  ;;  %v537_v15 = vadd.f32 %v2903_v48, %v2795_v20  ;;  %v55_v20 = vld [vmem:[%s3584_s0 + $0x48] sm:$0xff]  ;;  %v81_v10 = vld [vmem:[%s3584_s0 + $0x118] sm:$0xff] }
  0x5a   :  { %v403_v22 = vrot.slane %v402_v14, 2  ;;  %v538_v23 = vadd.f32 %v2925_v8, %v2823_v63  ;;  %v543_v34 = vmul.f32 0.020833334, %v535_v36  ;;  %v544_v25 = vmul.f32 0.020833334, %v536_v58 }
  0x5b   :  { %vm600_vm5 = vcmask 1045509   ;;  %v2953_v26 = vadd.f32 %v383_v18, %v382_v21  ;;  %v394_v5 = vrot.slane %v393_v19, 1  ;;  %v539_v54 = vadd.f32 %v2947_v17, %v2837_v24  ;;  %v56_v24 = vld [vmem:[%s3584_s0 + $0x50] sm:$0xff] }
  0x5c   :  { %v545_v27 = vmul.f32 0.020833334, %v537_v15  ;;  %v404_v28 = vadd.f32 %v403_v22, %v402_v14  ;;  %v546_v29 = vmul.f32 0.020833334, %v538_v23  ;;  %v551_v30 = vpack.c.bf16 %v543_v34, %v543_v34  ;;  %v91_v15 = vld [vmem:[%s3584_s0 + $0x168] sm:$0xff]  ;;  %v92_v22 = vld [vmem:[%s3584_s0 + $0x170] sm:$0xff] }
  0x5d   :  { %v552_v32 = vpack.c.bf16 %v544_v25, %v544_v25  ;;  %vm602_vm6 = vcmask 1046534   ;;  %v2960_v63 = vadd.f32 %v394_v5, %v393_v19  ;;  %v540_v35 = vadd.f32 %v2953_v26, %v2846_v38 }
  0x5e   :  { %v547_v39 = vmul.f32 0.020833334, %v539_v54  ;;  %v553_v40 = vpack.c.bf16 %v545_v27, %v545_v27  ;;  %v405_v42 = vrot.slane %v404_v28, 1  ;;  %v554_v43 = vpack.c.bf16 %v546_v29, %v546_v29  ;;  %v103_v29 = vld [vmem:[%s3584_s0 + $0x1c8] sm:$0xff] }
  0x5f   :  { %v584_v44 = vunpack.c.l.b16 %v551_v30  ;;  %v585_v45 = vunpack.c.l.b16 %v552_v32  ;;  %v541_v46 = vadd.f32 %v2960_v63, %v2863_v57  ;;  %v548_v47 = vmul.f32 0.020833334, %v540_v35  ;;  %v104_v30 = vld [vmem:[%s3584_s0 + $0x1d0] sm:$0xff]  ;;  %v105_v32 = vld [vmem:[%s3584_s0 + $0x1d8] sm:$0xff] }
  0x60   :  { %v555_v49 = vpack.c.bf16 %v547_v39, %v547_v39  ;;  %v586_v38 = vunpack.c.l.b16 %v553_v40  ;;  %vm604_vm7 = vcmask 1047559   ;;  %v2981_v56 = vadd.f32 %v405_v42, %v404_v28 }
  0x61   :  { %v587_v60 = vunpack.c.l.b16 %v554_v43  ;;  %v593_v57 = vsel %vm592_vm1, %v585_v45, %v584_v44  ;;  %v407_v52 = vsel %vm142_vm0, %v55_v20, 0.0  ;;  %v549_v61 = vmul.f32 0.020833334, %v541_v46  ;;  %v115_v43 = vld [vmem:[%s3584_s0 + $0x228] sm:$0xff]  ;;  %v116_v44 = vld [vmem:[%s3584_s0 + $0x230] sm:$0xff] }
  0x62   :  { %v556_v2 = vpack.c.bf16 %v548_v47, %v548_v47  ;;  %v588_v3 = vunpack.c.l.b16 %v555_v49  ;;  %v595_v4 = vsel %vm594_vm2, %v586_v38, %v593_v57  ;;  %v542_v21 = vadd.f32 %v2981_v56, %v2880_v11  ;;  %v93_v11 = vld [vmem:[%s3584_s0 + $0x178] sm:$0xff] }
  0x63   :  { %v597_v12 = vsel %vm596_vm3, %v587_v60, %v595_v4  ;;  %v408_v14 = vsel %vm142_vm0, %v56_v24, 0.0  ;;  %v410_v36 = vsel %vm142_vm0, %v57_v41, 0.0  ;;  %v557_v58 = vpack.c.bf16 %v549_v61, %v549_v61  ;;  %v2246_v49 = vld [vmem:[%s3585_s1 + $0x88] ss:$16 sps:$4 sm:$0xff]   ;;  %v2251_v60 = vld [vmem:[%s3585_s1 + $0xac] ss:$16 sps:$4 sm:$0xff]  }
  0x64   :  { %v589_v18 = vunpack.c.l.b16 %v556_v2  ;;  %v599_v19 = vsel %vm598_vm4, %v588_v3, %v597_v12  ;;  %v409_v23 = vadd.f32 %v408_v14, %v407_v52  ;;  %v550_v34 = vmul.f32 0.020833334, %v542_v21  ;;  %v117_v57 = vld [vmem:[%s3584_s0 + $0x238] sm:$0xff]  ;;  %v127_v52 = vld [vmem:[%s3584_s0 + $0x288] sm:$0xff]  ;;  %v128_v14 = vld [vmem:[%s3584_s0 + $0x290] sm:$0xff] }
  0x65   :  { %v418_v25 = vsel %vm142_vm0, %v67_v50, 0.0  ;;  %v419_v5 = vsel %vm142_vm0, %v68_v51, 0.0  ;;  %v421_v54 = vsel %vm142_vm0, %v69_v55, 0.0  ;;  %v590_v27 = vunpack.c.l.b16 %v557_v58 }
  0x66   :  { %v601_v28 = vsel %vm600_vm5, %v589_v18, %v599_v19  ;;  %v411_v20 = vadd.f32 %v410_v36, %v409_v23  ;;  %v420_v35 = vadd.f32 %v419_v5, %v418_v25  ;;  %v558_v39 = vpack.c.bf16 %v550_v34, %v550_v34  ;;  %v129_v36 = vld [vmem:[%s3584_s0 + $0x298] sm:$0xff] }
  0x67   :  { %v429_v40 = vsel %vm142_vm0, %v79_v37, 0.0  ;;  %v430_v24 = vsel %vm142_vm0, %v80_v53, 0.0  ;;  %v432_v41 = vsel %vm142_vm0, %v81_v10, 0.0  ;;  %v603_v42 = vsel %vm602_vm6, %v590_v27, %v601_v28 }
  0x68   :  { %v412_v45 = vrot.slane %v411_v20, 4  ;;  %v422_v46 = vadd.f32 %v421_v54, %v420_v35  ;;  %v431_v47 = vadd.f32 %v430_v24, %v429_v40  ;;  %v591_v38 = vunpack.c.l.b16 %v558_v39  ;;  %v139_v35 = vld [vmem:[%s3584_s0 + $0x2e8] sm:$0xff] }
  0x69   :  { %v440_v50 = vsel %vm142_vm0, %v91_v15, 0.0  ;;  %v441_v51 = vsel %vm142_vm0, %v92_v22, 0.0  ;;  %v443_v55 = vsel %vm142_vm0, %v93_v11, 0.0  ;;  %v451_v53 = vsel %vm142_vm0, %v103_v29, 0.0  ;;  %v2249_v15 = vld [vmem:[%s3585_s1 + $0xa8] ss:$16 sps:$4 sm:$0xff]  }
  0x6a   :  { %v413_v61 = vadd.f32 %v412_v45, %v411_v20  ;;  %v423_v2 = vrot.slane %v422_v46, 4  ;;  %v433_v3 = vadd.f32 %v432_v41, %v431_v47  ;;  %v442_v4 = vadd.f32 %v441_v51, %v440_v50  ;;  %v2254_v20 = vld [vmem:[%s3585_s1 + $0xcc] ss:$16 sps:$4 sm:$0xff]   ;;  %v2252_v51 = vld [vmem:[%s3585_s1 + $0xc8] ss:$16 sps:$4 sm:$0xff]  }
  0x6b   :  { %v605_v37 = vsel %vm604_vm7, %v591_v38, %v603_v42  ;;  %v452_v10 = vsel %vm142_vm0, %v104_v30, 0.0  ;;  %v454_v21 = vsel %vm142_vm0, %v105_v32, 0.0  ;;  %v462_v23 = vsel %vm142_vm0, %v115_v43, 0.0  ;;  %v140_v42 = vld [vmem:[%s3584_s0 + $0x2f0] sm:$0xff] }
  0x6c   :  { %v3052_v12 = vpack.c.b16 %v605_v37, %v605_v37  ;;  %v414_v58 = vrot.slane %v413_v61, 2  ;;  %v424_v18 = vadd.f32 %v423_v2, %v422_v46  ;;  %v434_v19 = vrot.slane %v433_v3, 4  ;;  %v2257_v2 = vld [vmem:[%s3585_s1 + $0xec] ss:$16 sps:$4 sm:$0xff]  }
  0x6d   :  { %v444_v22 = vadd.f32 %v443_v55, %v442_v4  ;;  %v453_v11 = vadd.f32 %v452_v10, %v451_v53  ;;  %v463_v34 = vsel %vm142_vm0, %v116_v44, 0.0  ;;  %v465_v30 = vsel %vm142_vm0, %v117_v57, 0.0  ;;  %v141_v55 = vld [vmem:[%s3584_s0 + $0x2f8] sm:$0xff] }
  0x6e   :  { %1959 = vmatmul.mubr.msk.bf16.vlgmr.msra.gmra.mrb[0].mxu1 %vm142_vm0, %v3052_v12  ;;  %v415_v25 = vadd.f32 %v414_v58, %v413_v61  ;;  %v425_v5 = vrot.slane %v424_v18, 2  ;;  %v435_v54 = vadd.f32 %v434_v19, %v433_v3  ;;  %v464_v27 = vadd.f32 %v463_v34, %v462_v23 }
  0x6f   :  { %732 = vmatpush1.bf16.msra.mxu1 %v2246_v49  ;;  %763 = vmatprep.mubr.bf16.mxu1 %v2451_v0  ;;  %v445_v28 = vrot.slane %v444_v22, 4  ;;  %v455_v29 = vadd.f32 %v454_v21, %v453_v11  ;;  %v473_v32 = vsel %vm142_vm0, %v127_v52, 0.0  ;;  %v474_v45 = vsel %vm142_vm0, %v128_v14, 0.0 }
  0x70   :  { %733 = vmatprep.subr.bf16.mxu1 %v2251_v60  ;;  %v416_v39 = vrot.slane %v415_v25, 1  ;;  %v426_v40 = vadd.f32 %v425_v5, %v424_v18  ;;  %v436_v24 = vrot.slane %v435_v54, 2  ;;  %v466_v41 = vadd.f32 %v465_v30, %v464_v27  ;;  %v2262_v5 = vld [vmem:[%s3585_s1 + $0x4] ss:$16 sps:$4 sm:$0xff]  }
  0x71   :  { %v446_v43 = vadd.f32 %v445_v28, %v444_v22  ;;  %v456_v44 = vrot.slane %v455_v29, 4  ;;  %v476_v46 = vsel %vm142_vm0, %v129_v36, 0.0  ;;  %v475_v52 = vadd.f32 %v474_v45, %v473_v32  ;;  %v2255_v22 = vld [vmem:[%s3585_s1 + $0xe8] ss:$16 sps:$4 sm:$0xff]  }
  0x72   :  { %v417_v47 = vadd.f32 %v416_v39, %v415_v25  ;;  %v427_v49 = vrot.slane %v426_v40, 1  ;;  %v437_v38 = vadd.f32 %v436_v24, %v435_v54  ;;  %v467_v50 = vrot.slane %v466_v41, 4 }
  0x73   :  { %734 = vmatpush1.bf16.msra.mxu1 %v2249_v15  ;;  %v447_v60 = vrot.slane %v446_v43, 2  ;;  %v457_v57 = vadd.f32 %v456_v44, %v455_v29  ;;  %v484_v61 = vsel %vm142_vm0, %v139_v35, 0.0  ;;  %v485_v53 = vsel %vm142_vm0, %v140_v42, 0.0 }
  0x74   :  { %735 = vmatprep.subr.bf16.mxu1 %v2254_v20  ;;  %v428_v3 = vadd.f32 %v427_v49, %v426_v40  ;;  %v438_v4 = vrot.slane %v437_v38, 1  ;;  %v468_v37 = vadd.f32 %v467_v50, %v466_v41  ;;  %v477_v14 = vadd.f32 %v476_v46, %v475_v52  ;;  %v2260_v41 = vld [vmem:[%s3585_s1] ss:$16 sps:$4 sm:$0xff]  }
  0x75   :  { %v448_v10 = vadd.f32 %v447_v60, %v446_v43  ;;  %v458_v21 = vrot.slane %v457_v57, 2  ;;  %v486_v36 = vadd.f32 %v485_v53, %v484_v61  ;;  %v487_v19 = vsel %vm142_vm0, %v141_v55, 0.0 }
  0x76   :  { %v439_v58 = vadd.f32 %v438_v4, %v437_v38  ;;  %v469_v18 = vrot.slane %v468_v37, 2  ;;  %v961_v15 = vadd.f32 %v417_v47, %v2865_v59  ;;  %v478_v34 = vrot.slane %v477_v14, 4 }
  0x77   :  { %736 = vmatpush1.bf16.msra.mxu1 %v2252_v51  ;;  %v449_v11 = vrot.slane %v448_v10, 1  ;;  %v459_v23 = vadd.f32 %v458_v21, %v457_v57  ;;  %v488_v25 = vadd.f32 %v487_v19, %v486_v36  ;;  %v962_v27 = vadd.f32 %v428_v3, %v2898_v31 }
  0x78   :  { %737 = vmatprep.subr.bf16.mxu1 %v2257_v2  ;;  %v470_v54 = vadd.f32 %v469_v18, %v468_v37  ;;  %v963_v28 = vadd.f32 %v439_v58, %v2903_v48  ;;  %v969_v59 = vmul.f32 0.020833334, %v961_v15  ;;  %v479_v32 = vadd.f32 %v478_v34, %v477_v14  ;;  %v2268_v48 = vld [vmem:[%s3585_s1 + $0x24] ss:$16 sps:$4 sm:$0xff]  }
  0x79   :  { %v450_v29 = vadd.f32 %v449_v11, %v448_v10  ;;  %v460_v30 = vrot.slane %v459_v23, 1  ;;  %v489_v20 = vrot.slane %v488_v25, 4  ;;  %v970_v39 = vmul.f32 0.020833334, %v962_v27  ;;  %v2274_v2 = vld [vmem:[%s3585_s1 + $0x44] ss:$16 sps:$4 sm:$0xff]  }
  0x7a   :  { %v471_v35 = vrot.slane %v470_v54, 1  ;;  %v971_v40 = vmul.f32 0.020833334, %v963_v28  ;;  %v977_v24 = vpack.c.bf16 %v969_v59, %v969_v59  ;;  %v480_v43 = vrot.slane %v479_v32, 2 }
  0x7b   :  { %738 = vmatpush1.bf16.msra.mxu1 %v2255_v22  ;;  %v461_v42 = vadd.f32 %v460_v30, %v459_v23  ;;  %v490_v44 = vadd.f32 %v489_v20, %v488_v25  ;;  %v964_v31 = vadd.f32 %v450_v29, %v2925_v8  ;;  %v978_v46 = vpack.c.bf16 %v970_v39, %v970_v39  ;;  %v2266_v8 = vld [vmem:[%s3585_s1 + $0x20] ss:$16 sps:$4 sm:$0xff]  }
  0x7c   :  { %879 = vmatprep.subr.bf16.mxu1 %v2262_v5  ;;  %v472_v45 = vadd.f32 %v471_v35, %v470_v54  ;;  %v979_v47 = vpack.c.bf16 %v971_v40, %v971_v40  ;;  %v1010_v49 = vunpack.c.l.b16 %v977_v24  ;;  %v481_v38 = vadd.f32 %v480_v43, %v479_v32  ;;  %v2272_v22 = vld [vmem:[%s3585_s1 + $0x40] ss:$16 sps:$4 sm:$0xff]  }
  0x7d   :  { %v491_v50 = vrot.slane %v490_v44, 2  ;;  %v965_v51 = vadd.f32 %v461_v42, %v2947_v17  ;;  %v972_v55 = vmul.f32 0.020833334, %v964_v31  ;;  %v1011_v57 = vunpack.c.l.b16 %v978_v46 }
  0x7e   :  { %1960 = vmatmul.mubr.msk.bf16.vlgmr.msra.gmra.mrb[4].mxu1 %vm142_vm0, %v3052_v12  ;;  %v966_v60 = vadd.f32 %v472_v45, %v2953_v26  ;;  %v1012_v52 = vunpack.c.l.b16 %v979_v47  ;;  %v503_v61 = vmul.f32 0.020833334, %v2908_v33  ;;  %v482_v17 = vrot.slane %v481_v38, 1 }
  0x7f   :  { %880 = vmatpush1.bf16.msra.mxu1 %v2260_v41  ;;  %911 = vmatprep.mubr.bf16.mxu1 %v2451_v0  ;;  %v492_v3 = vadd.f32 %v491_v50, %v490_v44  ;;  %v973_v12 = vmul.f32 0.020833334, %v965_v51  ;;  %v980_v4 = vpack.c.bf16 %v972_v55, %v972_v55  ;;  %v1018_v53 = vsel %vm592_vm1, %v1011_v57, %v1010_v49  ;;  %v2284_v41 = vld [vmem:[%s3585_s1 + $0xc] ss:$16 sps:$4 sm:$0xff]  }
  0x80   :  { %881 = vmatprep.subr.bf16.mxu1 %v2268_v48  ;;  %v974_v37 = vmul.f32 0.020833334, %v966_v60  ;;  %v504_v26 = vmul.f32 0.020833334, %v2912_v62  ;;  %v505_v10 = vmul.f32 0.020833334, %v2916_v1  ;;  %v483_v33 = vadd.f32 %v482_v17, %v481_v38 }
  0x81   :  { %v493_v21 = vrot.slane %v492_v3, 1  ;;  %v981_v14 = vpack.c.bf16 %v973_v12, %v973_v12  ;;  %v1013_v36 = vunpack.c.l.b16 %v980_v4  ;;  %v1019_v18 = vsel %vm594_vm2, %v1012_v52, %v1018_v53  ;;  %v2280_v62 = vld [vmem:[%s3585_s1 + $0x64] ss:$16 sps:$4 sm:$0xff]   ;;  %v2306_v60 = vld [vmem:[%s3587_s3] ss:$8 sps:$4 sm:$0xff]  }
  0x82   :  { %v982_v58 = vpack.c.bf16 %v974_v37, %v974_v37  ;;  %v506_v19 = vmul.f32 0.020833334, %v2920_v7  ;;  %v507_v15 = vmul.f32 0.020833334, %v2929_v9  ;;  %v967_v11 = vadd.f32 %v483_v33, %v2960_v63  ;;  %v2282_v12 = vld [vmem:[%s3585_s1 + $0x8] ss:$16 sps:$4 sm:$0xff]  }
  0x83   :  { %882 = vmatpush1.bf16.msra.mxu1 %v2266_v8  ;;  %v494_v1 = vadd.f32 %v493_v21, %v492_v3  ;;  %v1014_v23 = vunpack.c.l.b16 %v981_v14  ;;  %v1020_v34 = vsel %vm596_vm3, %v1013_v36, %v1019_v18  ;;  %v508_v7 = vmul.f32 0.020833334, %v2933_v6  ;;  %v2278_v6 = vld [vmem:[%s3585_s1 + $0x60] ss:$16 sps:$4 sm:$0xff]   ;;  %v2287_v37 = vld [vmem:[%s3585_s1 + $0x2c] ss:$16 sps:$4 sm:$0xff]  }
  0x84   :  { %883 = vmatprep.subr.bf16.mxu1 %v2274_v2  ;;  %v1015_v25 = vunpack.c.l.b16 %v982_v58  ;;  %v509_v9 = vmul.f32 0.020833334, %v2937_v13  ;;  %v510_v5 = vmul.f32 0.020833334, %v2941_v16  ;;  %v975_v27 = vmul.f32 0.020833334, %v967_v11 }
  0x85   :  { %v968_v54 = vadd.f32 %v494_v1, %v2981_v56  ;;  %v1021_v28 = vsel %vm598_vm4, %v1014_v23, %v1020_v34  ;;  %v511_v59 = vpack.c.bf16 %v503_v61, %v503_v61  ;;  %v512_v63 = vpack.c.bf16 %v504_v26, %v504_v26  ;;  %v2311_v61 = vld [vmem:[%s3587_s3 + $0x14] ss:$8 sps:$4 sm:$0xff]   ;;  %v2309_v53 = vld [vmem:[%s3587_s3 + $0x10] ss:$8 sps:$4 sm:$0xff]   ;;  %v2314_v26 = vld [vmem:[%s3587_s3 + $0x24] ss:$8 sps:$4 sm:$0xff]  }
  0x86   :  { %v1022_v29 = vsel %vm600_vm5, %v1015_v25, %v1021_v28  ;;  %v513_v30 = vpack.c.bf16 %v505_v10, %v505_v10  ;;  %v514_v32 = vpack.c.bf16 %v506_v19, %v506_v19  ;;  %v983_v13 = vpack.c.bf16 %v975_v27, %v975_v27  ;;  %v2285_v10 = vld [vmem:[%s3585_s1 + $0x28] ss:$16 sps:$4 sm:$0xff]   ;;  %v2290_v33 = vld [vmem:[%s3585_s1 + $0x4c] ss:$16 sps:$4 sm:$0xff]  }
  0x87   :  { %884 = vmatpush1.bf16.msra.mxu1 %v2272_v22  ;;  %v976_v20 = vmul.f32 0.020833334, %v968_v54  ;;  %v515_v35 = vpack.c.bf16 %v507_v15, %v507_v15  ;;  %v516_v16 = vpack.c.bf16 %v508_v7, %v508_v7  ;;  %v517_v56 = vpack.c.bf16 %v509_v9, %v509_v9  ;;  %v2312_v21 = vld [vmem:[%s3587_s3 + $0x20] ss:$8 sps:$4 sm:$0xff]   ;;  %v2317_v14 = vld [vmem:[%s3587_s3 + $0x34] ss:$8 sps:$4 sm:$0xff]  }
  0x88   :  { %885 = vmatprep.subr.bf16.mxu1 %v2280_v62  ;;  %v518_v39 = vpack.c.bf16 %v510_v5, %v510_v5  ;;  %v780_v40 = vunpack.c.l.b16 %v511_v59  ;;  %v781_v24 = vunpack.c.l.b16 %v512_v63  ;;  %v1016_v43 = vunpack.c.l.b16 %v983_v13  ;;  %v2288_v36 = vld [vmem:[%s3585_s1 + $0x48] ss:$16 sps:$4 sm:$0xff]   ;;  %v2293_v58 = vld [vmem:[%s3585_s1 + $0x6c] ss:$16 sps:$4 sm:$0xff]  }
  0x89   :  { %v984_v42 = vpack.c.bf16 %v976_v20, %v976_v20  ;;  %v782_v44 = vunpack.c.l.b16 %v513_v30  ;;  %v783_v31 = vunpack.c.l.b16 %v514_v32  ;;  %v784_v48 = vunpack.c.l.b16 %v515_v35  ;;  %v2315_v18 = vld [vmem:[%s3587_s3 + $0x30] ss:$8 sps:$4 sm:$0xff]   ;;  %v2320_v19 = vld [vmem:[%s3587_s3 + $0x44] ss:$8 sps:$4 sm:$0xff]   ;;  %v2318_v62 = vld [vmem:[%s3587_s3 + $0x40] ss:$8 sps:$4 sm:$0xff]  }
  0x8a   :  { %v1023_v46 = vsel %vm602_vm6, %v1016_v43, %v1022_v29  ;;  %v785_v47 = vunpack.c.l.b16 %v516_v16  ;;  %v788_v49 = vsel %vm592_vm1, %v781_v24, %v780_v40  ;;  %v786_v38 = vunpack.c.l.b16 %v517_v56  ;;  %v2291_v15 = vld [vmem:[%s3585_s1 + $0x68] ss:$16 sps:$4 sm:$0xff]   ;;  %v2296_v22 = vld [vmem:[%s3585_s1 + $0x10c] ss:$16 sps:$4 sm:$0xff]  }
  0x8b   :  { %886 = vmatpush1.bf16.msra.mxu1 %v2278_v6  ;;  %v1017_v45 = vunpack.c.l.b16 %v984_v42  ;;  %v789_v50 = vsel %vm594_vm2, %v782_v44, %v788_v49  ;;  %v787_v55 = vunpack.c.l.b16 %v518_v39  ;;  %v2323_v1 = vld [vmem:[%s3587_s3 + $0x54] ss:$8 sps:$4 sm:$0xff]   ;;  %v2294_v11 = vld [vmem:[%s3585_s1 + $0x108] ss:$16 sps:$4 sm:$0xff]   ;;  %v2326_v27 = vld [vmem:[%s3587_s3 + $0x64] ss:$8 sps:$4 sm:$0xff]  }
  0x8c   :  { %920 = vmatprep.subr.bf16.mxu1 %v2284_v41  ;;  %v790_v8 = vsel %vm596_vm3, %v783_v31, %v789_v50  ;;  %v2299_v23 = vld [vmem:[%s3585_s1 + $0x12c] ss:$16 sps:$4 sm:$0xff]   ;;  %v2321_v34 = vld [vmem:[%s3587_s3 + $0x50] ss:$8 sps:$4 sm:$0xff]   ;;  %v2324_v54 = vld [vmem:[%s3587_s3 + $0x60] ss:$8 sps:$4 sm:$0xff]   ;;  %v1197_v31 = vlaneseq }
  0x8d   :  { %v1024_v51 = vsel %vm604_vm7, %v1017_v45, %v1023_v46  ;;  %v791_v52 = vsel %vm598_vm4, %v784_v48, %v790_v8  ;;  %v2297_v25 = vld [vmem:[%s3585_s1 + $0x128] ss:$16 sps:$4 sm:$0xff]   ;;  %v2302_v7 = vld [vmem:[%s3585_s1 + $0x14c] ss:$16 sps:$4 sm:$0xff]   ;;  %v3306_v46 = vld [vmem:[#allocation2] sm:$0xf] }
  0x8e   :  { %v1025_v57 = vpack.c.b16 %v1024_v51, %v1024_v51  ;;  %v792_v2 = vsel %vm600_vm5, %v785_v47, %v791_v52  ;;  %v2300_v9 = vld [vmem:[%s3585_s1 + $0x148] ss:$16 sps:$4 sm:$0xff]   ;;  %v2305_v5 = vld [vmem:[%s3585_s1 + $0x16c] ss:$16 sps:$4 sm:$0xff]   ;;  %v3303_v48 = vshrl.u32 %v1197_v31, 7  ;;  %v1725_v49 = vld [vmem:[%s3589_s5 + $0x80] sm:$0xff] }
  0x8f   :  { %v793_v17 = vsel %vm602_vm6, %v786_v38, %v792_v2  ;;  %v2329_v28 = vld [vmem:[%s3587_s3 + $0x74] ss:$8 sps:$4 sm:$0xff]   ;;  %v2327_v59 = vld [vmem:[%s3587_s3 + $0x70] ss:$8 sps:$4 sm:$0xff]   ;;  %v2332_v29 = vld [vmem:[%s3587_s3 + $0x84] ss:$8 sps:$4 sm:$0xff]  }
  0x90   :  { %2011 = vmatmul.mubr.msk.bf16.vlgmr.msra.gmra.mrb[0].mxu0 %vm142_vm0, %v1025_v57  ;;  %v794_v3 = vsel %vm604_vm7, %v787_v55, %v793_v17  ;;  %v2330_v63 = vld [vmem:[%s3587_s3 + $0x80] ss:$8 sps:$4 sm:$0xff]   ;;  %v2333_v30 = vld [vmem:[%s3587_s3 + $0x90] ss:$8 sps:$4 sm:$0xff]   ;;  %v2335_v32 = vld [vmem:[%s3587_s3 + $0x94] ss:$8 sps:$4 sm:$0xff]  }
  0x91   :  { %1626 = vmatpush1.bf16.msra.mxu0 %v2306_v60  ;;  %v795_v4 = vpack.c.b16 %v794_v3, %v794_v3  ;;  %v2336_v6 = vld [vmem:[%s3587_s3 + $0xa0] ss:$8 sps:$4 sm:$0xff]   ;;  %v2338_v20 = vld [vmem:[%s3587_s3 + $0xa4] ss:$8 sps:$4 sm:$0xff]   ;;  %v2341_v13 = vld [vmem:[%s3587_s3 + $0xb4] ss:$8 sps:$4 sm:$0xff]  }
  0x92   :  { %1627 = vmatprep.subr.bf16.mxu0 %v2311_v61  ;;  %v2339_v35 = vld [vmem:[%s3587_s3 + $0xb0] ss:$8 sps:$4 sm:$0xff]   ;;  %v2344_v16 = vld [vmem:[%s3587_s3 + $0xc4] ss:$8 sps:$4 sm:$0xff]   ;;  %v2342_v56 = vld [vmem:[%s3587_s3 + $0xc0] ss:$8 sps:$4 sm:$0xff]  }
  0x93   :  { %1977 = vmatmul.mubr.msk.bf16.vlgmr.msra.gmra.mrb[8].mxu1 %vm142_vm0, %v795_v4  ;;  %v2347_v39 = vld [vmem:[%s3587_s3 + $0xd4] ss:$8 sps:$4 sm:$0xff]   ;;  %v2345_v40 = vld [vmem:[%s3587_s3 + $0xd0] ss:$8 sps:$4 sm:$0xff]   ;;  %v2350_v24 = vld [vmem:[%s3587_s3 + $0xe4] ss:$8 sps:$4 sm:$0xff]  }
  0x94   :  { %921 = vmatpush1.bf16.msra.mxu1 %v2282_v12  ;;  %952 = vmatprep.mubr.bf16.mxu1 %v2451_v0  ;;  %v2348_v41 = vld [vmem:[%s3587_s3 + $0xe0] ss:$8 sps:$4 sm:$0xff]   ;;  %v2353_v42 = vld [vmem:[%s3587_s3 + $0xf4] ss:$8 sps:$4 sm:$0xff]   ;;  %v2351_v43 = vld [vmem:[%s3587_s3 + $0xf0] ss:$8 sps:$4 sm:$0xff]  }
  0x95   :  { %922 = vmatprep.subr.bf16.mxu1 %v2287_v37  ;;  %1628 = vmatpush1.bf16.msra.mxu0 %v2309_v53  ;;  %v2356_v44 = vld [vmem:[%s3587_s3 + $0x104] ss:$8 sps:$4 sm:$0xff]   ;;  %v1207_v45 = vsub.s32 2, %v3303_v48  ;;  %v1727_v8 = vld [vmem:[%s3589_s5 + $0x90] sm:$0xff]  ;;  %v1728_v60 = vld [vmem:[%s3589_s5 + $0x98] sm:$0xff]  ;;  %vm2453_vm8 = vmmov 0  }
  0x96   :  { %1629 = vmatprep.subr.bf16.mxu0 %v2314_v26  ;;  %v1726_v38 = vld [vmem:[%s3589_s5 + $0x88] sm:$0xff]  ;;  %v1709_v50 = vld [vmem:[%s3589_s5] sm:$0xff]  ;;  %v2170_v52 = vpack.c.bf16 %v1728_v60, %v1727_v8  ;;  %v1711_v61 = vld [vmem:[%s3589_s5 + $0x10] sm:$0xff] }
  0x97   :  { %v3309_v47 = vrot.slane %v3306_v46, %v1207_v45  ;;  %v2166_v51 = vpack.c.bf16 %v1726_v38, %v1725_v49  ;;  %v1710_v55 = vld [vmem:[%s3589_s5 + $0x8] sm:$0xff]  ;;  %v1712_v2 = vld [vmem:[%s3589_s5 + $0x18] sm:$0xff]  ;;  %v1729_v17 = vld [vmem:[%s3589_s5 + $0xa0] sm:$0xff] }
  0x98   :  { %923 = vmatpush1.bf16.msra.mxu1 %v2285_v10  ;;  %v1730_v3 = vld [vmem:[%s3589_s5 + $0xa8] sm:$0xff]  ;;  %v2172_v12 = vpack.c.bf16 %v1712_v2, %v1711_v61  ;;  %v1713_v37 = vld [vmem:[%s3589_s5 + $0x20] sm:$0xff]  ;;  %v1731_v26 = vld [vmem:[%s3589_s5 + $0xb0] sm:$0xff] }
  0x99   :  { %924 = vmatprep.subr.bf16.mxu1 %v2290_v33  ;;  %1630 = vmatpush1.bf16.msra.mxu0 %v2312_v21  ;;  %v1714_v53 = vld [vmem:[%s3589_s5 + $0x28] sm:$0xff]  ;;  %v1732_v10 = vld [vmem:[%s3589_s5 + $0xb8] sm:$0xff] }
  0x9a   :  { %1631 = vmatprep.subr.bf16.mxu0 %v2317_v14  ;;  %v2176_v33 = vpack.c.bf16 %v1714_v53, %v1713_v37  ;;  %v2178_v21 = vpack.c.bf16 %v1732_v10, %v1731_v26  ;;  %v1715_v14 = vld [vmem:[%s3589_s5 + $0x30] sm:$0xff]  ;;  %v2360_v53 = vld [vmem:[%s3587_s3 + $0x120] ss:$8 sps:$4 sm:$0xff]  }
  0x9b   :  { %v2359_v61 = vld [vmem:[%s3587_s3 + $0x114] ss:$8 sps:$4 sm:$0xff]   ;;  %v2357_v2 = vld [vmem:[%s3587_s3 + $0x110] ss:$8 sps:$4 sm:$0xff]  }
  0x9c   :  { %925 = vmatpush1.bf16.msra.mxu1 %v2288_v36  ;;  %v1716_v36 = vld [vmem:[%s3589_s5 + $0x38] sm:$0xff] }
  0x9d   :  { %926 = vmatprep.subr.bf16.mxu1 %v2293_v58  ;;  %1632 = vmatpush1.bf16.msra.mxu0 %v2315_v18  ;;  %v1733_v58 = vld [vmem:[%s3589_s5 + $0xc0] sm:$0xff]  ;;  %v1734_v18 = vld [vmem:[%s3589_s5 + $0xc8] sm:$0xff]  ;;  %v2365_v10 = vld [vmem:[%s3587_s3 + $0x134] ss:$8 sps:$4 sm:$0xff]  }
  0x9e   :  { %1633 = vmatprep.subr.bf16.mxu0 %v2320_v19  ;;  %v2180_v19 = vpack.c.bf16 %v1716_v36, %v1715_v14  ;;  %v2368_v14 = vld [vmem:[%s3587_s3 + $0x144] ss:$8 sps:$4 sm:$0xff]   ;;  %v2366_v36 = vld [vmem:[%s3587_s3 + $0x140] ss:$8 sps:$4 sm:$0xff]  }
  0xa0   :  { %927 = vmatpush1.bf16.msra.mxu1 %v2291_v15 }
  0xa1   :  { %1150 = vmatprep.subr.bf16.mxu1 %v2296_v22  ;;  %1634 = vmatpush1.bf16.msra.mxu0 %v2318_v62  ;;  %v2182_v22 = vpack.c.bf16 %v1734_v18, %v1733_v58  ;;  %v1717_v62 = vld [vmem:[%s3589_s5 + $0x40] sm:$0xff]  ;;  %v2371_v58 = vld [vmem:[%s3587_s3 + $0x154] ss:$8 sps:$4 sm:$0xff]   ;;  %v1211_v18 = vsub.s32 3, %v3303_v48 }
  0xa2   :  { %1635 = vmatprep.subr.bf16.mxu0 %v2323_v1  ;;  %v1718_v1 = vld [vmem:[%s3589_s5 + $0x48] sm:$0xff] }
  0xa3   :  { %1978 = vmatmul.mubr.msk.bf16.vlgmr.msra.gmra.mrb[12].mxu1 %vm142_vm0, %v795_v4  ;;  %v2174_v4 = vpack.c.bf16 %v1730_v3, %v1729_v17  ;;  %v2362_v17 = vld [vmem:[%s3587_s3 + $0x124] ss:$8 sps:$4 sm:$0xff]  }
  0xa4   :  { %1151 = vmatpush1.bf16.msra.mxu1 %v2294_v11  ;;  %1182 = vmatprep.mubr.bf16.mxu1 %v2451_v0  ;;  %v2303_v0 = vld [vmem:[%s3585_s1 + $0x168] ss:$16 sps:$4 sm:$0xff]  }
  0xa5   :  { %1152 = vmatprep.subr.bf16.mxu1 %v2299_v23  ;;  %1636 = vmatpush1.bf16.msra.mxu0 %v2321_v34  ;;  %v1735_v23 = vld [vmem:[%s3589_s5 + $0xd0] sm:$0xff]  ;;  %v1736_v34 = vld [vmem:[%s3589_s5 + $0xd8] sm:$0xff] }
  0xa6   :  { %1637 = vmatprep.subr.bf16.mxu0 %v2326_v27  ;;  %v1737_v27 = vld [vmem:[%s3589_s5 + $0xe0] sm:$0xff] }
  0xa8   :  { %1153 = vmatpush1.bf16.msra.mxu1 %v2297_v25 }
  0xa9   :  { %1154 = vmatprep.subr.bf16.mxu1 %v2302_v7  ;;  %1638 = vmatpush1.bf16.msra.mxu0 %v2324_v54  ;;  %v1720_v54 = vld [vmem:[%s3589_s5 + $0x58] sm:$0xff] }
  0xaa   :  { %1639 = vmatprep.subr.bf16.mxu0 %v2329_v28  ;;  %v1738_v28 = vld [vmem:[%s3589_s5 + $0xe8] sm:$0xff] }
  0xac   :  { %1155 = vmatpush1.bf16.msra.mxu1 %v2300_v9  ;;  %v2184_v9 = vpack.c.bf16 %v1718_v1, %v1717_v62  ;;  %v1212_v62 = vrot.slane %v3306_v46, %v1211_v18 }
  0xad   :  { %1156 = vmatprep.subr.bf16.mxu1 %v2305_v5  ;;  %1640 = vmatpush1.bf16.msra.mxu0 %v2327_v59  ;;  %v2186_v5 = vpack.c.bf16 %v1736_v34, %v1735_v23  ;;  %v2372_v34 = vld [vmem:[%s3587_s3 + $0x160] ss:$8 sps:$4 sm:$0xff]  }
  0xae   :  { %1641 = vmatprep.subr.bf16.mxu0 %v2332_v29  ;;  %v2190_v29 = vpack.c.bf16 %v1738_v28, %v1737_v27  ;;  %v2380_v27 = vld [vmem:[%s3587_s3 + $0x184] ss:$8 sps:$4 sm:$0xff]  }
  0xb0   :  { %1157 = vmatpush1.bf16.msra.mxu1 %v2303_v0  ;;  %v1719_v0 = vld [vmem:[%s3589_s5 + $0x50] sm:$0xff] }
  0xb1   :  { %1642 = vmatpush1.bf16.msra.mxu0 %v2330_v63  ;;  %2167 = vmatprep.subr.bf16.mxu1 %v2166_v51  ;;  %v2188_v59 = vpack.c.bf16 %v1720_v54, %v1719_v0 }
  0xb2   :  { %1643 = vmatprep.subr.bf16.mxu0 %v2335_v32 }
  0xb3   :  { %2012 = vmatmul.mubr.msk.bf16.vlgmr.msra.gmra.mrb[16].mxu1 %vm142_vm0, %v1025_v57  ;;  %v2168_v57 = vpack.c.bf16 %v1710_v55, %v1709_v50 }
  0xb5   :  { %1644 = vmatpush1.bf16.msra.mxu0 %v2333_v30  ;;  %2169 = vmatpush3.bf16.msra.mxu1 %v2168_v57  ;;  %v2354_v57 = vld [vmem:[%s3587_s3 + $0x100] ss:$8 sps:$4 sm:$0xff]  }
  0xb6   :  { %1645 = vmatprep.subr.bf16.mxu0 %v2338_v20  ;;  %2171 = vmatprep.subr.bf16.mxu1 %v2170_v52 }
  0xb9   :  { %1646 = vmatpush1.bf16.msra.mxu0 %v2336_v6  ;;  %2173 = vmatpush3.bf16.msra.mxu1 %v2172_v12 }
  0xba   :  { %1647 = vmatprep.subr.bf16.mxu0 %v2341_v13  ;;  %2175 = vmatprep.subr.bf16.mxu1 %v2174_v4  ;;  %v1199_v13 = vsub.s32 0, %v3303_v48 }
  0xbd   :  { %1648 = vmatpush1.bf16.msra.mxu0 %v2339_v35  ;;  %2177 = vmatpush3.bf16.msra.mxu1 %v2176_v33 }
  0xbe   :  { %1649 = vmatprep.subr.bf16.mxu0 %v2344_v16  ;;  %2179 = vmatprep.subr.bf16.mxu1 %v2178_v21  ;;  %v1203_v16 = vsub.s32 1, %v3303_v48  ;;  %v2363_v21 = vld [vmem:[%s3587_s3 + $0x130] ss:$8 sps:$4 sm:$0xff]  }
  0xbf   :  { %v1820_v48 = vld [vmem:[%s3591_s7 + $0x10] sm:$0xff] }
  0xc1   :  { %1650 = vmatpush1.bf16.msra.mxu0 %v2342_v56  ;;  %2181 = vmatpush3.bf16.msra.mxu1 %v2180_v19  ;;  %v2369_v19 = vld [vmem:[%s3587_s3 + $0x150] ss:$8 sps:$4 sm:$0xff]  }
  0xc2   :  { %1651 = vmatprep.subr.bf16.mxu0 %v2347_v39  ;;  %2183 = vmatprep.subr.bf16.mxu1 %v2182_v22 }
  0xc5   :  { %1652 = vmatpush1.bf16.msra.mxu0 %v2345_v40  ;;  %2185 = vmatpush3.bf16.msra.mxu1 %v2184_v9  ;;  %v2377_v9 = vld [vmem:[%s3587_s3 + $0x174] ss:$8 sps:$4 sm:$0xff]  }
  0xc6   :  { %1653 = vmatprep.subr.bf16.mxu0 %v2350_v24  ;;  %2187 = vmatprep.subr.bf16.mxu1 %v2186_v5 }
  0xc9   :  { %1654 = vmatpush1.bf16.msra.mxu0 %v2348_v41  ;;  %2189 = vmatpush3.bf16.msra.mxu1 %v2188_v59  ;;  %v1200_v41 = vrot.slane %v3306_v46, %v1199_v13  ;;  %v2383_v59 = vld [vmem:[%s3587_s3 + $0x194] ss:$8 sps:$4 sm:$0xff]  }
  0xca   :  { %1655 = vmatprep.subr.bf16.mxu0 %v2353_v42  ;;  %2191 = vmatprep.subr.bf16.mxu1 %v2190_v29  ;;  %v2381_v29 = vld [vmem:[%s3587_s3 + $0x190] ss:$8 sps:$4 sm:$0xff]  }
  0xcd   :  { %1656 = vmatpush1.bf16.msra.mxu0 %v2351_v43 }
  0xce   :  { %1666 = vmatprep.subr.bf16.mxu0 %v2356_v44  ;;  %v1204_v44 = vrot.slane %v3306_v46, %v1203_v16  ;;  %v2375_v46 = vld [vmem:[%s3587_s3 + $0x170] ss:$8 sps:$4 sm:$0xff]  }
 0x141   :  { %v724_v15 = vpop.f32.mrb[0].mxu1 }
 0x142   :  { %v726_v11 = vpop.f32.mrb[1].mxu1 }
 0x143   :  { %v728_v25 = vpop.f32.mrb[2].mxu1 }
 0x144   :  { %v729_v7 = vpop.f32.mrb[3].mxu1 }
 0x151   :  { %v765_v63 = vpop.f32.mrb[4].mxu1 }
 0x152   :  { %v767_v30 = vpop.f32.mrb[5].mxu1 }
 0x153   :  { %v769_v32 = vpop.f32.mrb[6].mxu1 }
 0x154   :  { %v770_v6 = vpop.f32.mrb[7].mxu1  ;;  %v2389_v32 = vld [vmem:[%s3587_s3 + $0x1b4] ss:$8 sps:$4 sm:$0xff]  }
 0x155   :  { %v2387_v6 = vld [vmem:[%s3587_s3 + $0x1b0] ss:$8 sps:$4 sm:$0xff]  }
 0x163   :  { %v1143_v20 = vpop.f32.mrb[0].mxu0 }
 0x164   :  { %v1145_v35 = vpop.f32.mrb[1].mxu0 }
 0x165   :  { %v1147_v56 = vpop.f32.mrb[2].mxu0 }
 0x166   :  { %v1148_v39 = vpop.f32.mrb[3].mxu0  ;;  %v913_v40 = vpop.f32.mrb[8].mxu1  ;;  %v2395_v56 = vld [vmem:[%s3587_s3 + $0x1d4] ss:$8 sps:$4 sm:$0xff]  }
 0x167   :  { %v914_v24 = vadd.f32 %v913_v40, %v724_v15  ;;  %v915_v42 = vpop.f32.mrb[9].mxu1  ;;  %v2374_v15 = vld [vmem:[%s3587_s3 + $0x164] ss:$8 sps:$4 sm:$0xff]   ;;  %v2393_v39 = vld [vmem:[%s3587_s3 + $0x1d0] ss:$8 sps:$4 sm:$0xff]  }
 0x168   :  { %v916_v43 = vadd.f32 %v915_v42, %v726_v11  ;;  %v917_v31 = vpop.f32.mrb[10].mxu1  ;;  %v2398_v40 = vld [vmem:[%s3587_s3 + $0x1e4] ss:$8 sps:$4 sm:$0xff]   ;;  %v2399_v42 = vld [vmem:[%s3587_s3 + $0x1f0] ss:$8 sps:$4 sm:$0xff]  }
 0x169   :  { %v1191_v45 = vadd.f32 %v1143_v20, %v914_v24  ;;  %v918_v49 = vpop.f32.mrb[11].mxu1  ;;  %v2392_v20 = vld [vmem:[%s3587_s3 + $0x1c4] ss:$8 sps:$4 sm:$0xff]   ;;  %v2396_v24 = vld [vmem:[%s3587_s3 + $0x1e0] ss:$8 sps:$4 sm:$0xff]  }
 0x16a   :  { %v1192_v38 = vadd.f32 %v1145_v35, %v916_v43  ;;  %v2390_v35 = vld [vmem:[%s3587_s3 + $0x1c0] ss:$8 sps:$4 sm:$0xff]  }
 0x16b   :  { %v1217_v50 = vadd.f32 %v1200_v41, %v1191_v45  ;;  %v2401_v41 = vld [vmem:[%s3587_s3 + $0x1f4] ss:$8 sps:$4 sm:$0xff]   ;;  %v1721_v31 = vld [vmem:[%s3589_s5 + $0x60] sm:$0xff]  ;;  %v1722_v45 = vld [vmem:[%s3589_s5 + $0x68] sm:$0xff] }
 0x16c   :  { %v1218_v51 = vadd.f32 %v1204_v44, %v1192_v38  ;;  %v2192_v49 = vpack.c.bf16 %v1722_v45, %v1721_v31  ;;  %v1739_v38 = vld [vmem:[%s3589_s5 + $0xf0] sm:$0xff] }
 0x16d   :  { %v1221_v55 = vmax.f32 %v1217_v50, 0.0  ;;  %v1740_v50 = vld [vmem:[%s3589_s5 + $0xf8] sm:$0xff] }
 0x16e   :  { %v1222_v8 = vmax.f32 %v1218_v51, 0.0  ;;  %2193 = vmatpush3.bf16.msra.mxu1 %v2192_v49  ;;  %v2194_v51 = vpack.c.bf16 %v1740_v50, %v1739_v38 }
 0x16f   :  { %v1225_v52 = vpack.c.bf16 %v1221_v55, %v1221_v55  ;;  %v1723_v55 = vld [vmem:[%s3589_s5 + $0x70] sm:$0xff] }
 0x170   :  { %v1226_v60 = vpack.c.bf16 %v1222_v8, %v1222_v8  ;;  %v1724_v8 = vld [vmem:[%s3589_s5 + $0x78] sm:$0xff]  ;;  %2195 = vmatprep.subr.bf16.mxu1 %v2194_v51 }
 0x172   :  { %1657 = vmatprep.mubr.bf16.mxu0 %v1226_v60  ;;  %v2196_v60 = vpack.c.bf16 %v1724_v8, %v1723_v55 }
 0x173   :  { %1658 = vmatmul.mubr.bf16.vlgmr.msra.gmra.mrb[4].mxu0 %v1225_v52  ;;  %v1293_v52 = vld [vmem:[%s3588_s4] sm:$0x3] }
 0x174   :  { %1667 = vmatpush1.bf16.msra.mxu0 %v2354_v57  ;;  %2197 = vmatpush3.bf16.msra.mxu1 %v2196_v60  ;;  %v2452_v57 = vmov 0.0|0.0  }
 0x175   :  { %1668 = vmatprep.subr.bf16.mxu0 %v2359_v61  ;;  %2198 = vmatprep.subr.bf16.mxu1 %v2452_v57  ;;  %v1298_v61 = vrot.slane %v1293_v52, %v1199_v13 }
 0x176   :  { %v954_v3 = vpop.f32.mrb[12].mxu1 }
 0x177   :  { %v955_v12 = vadd.f32 %v954_v3, %v765_v63  ;;  %v956_v4 = vpop.f32.mrb[13].mxu1  ;;  %v2386_v63 = vld [vmem:[%s3587_s3 + $0x1a4] ss:$8 sps:$4 sm:$0xff]  }
 0x178   :  { %v957_v37 = vadd.f32 %v956_v4, %v767_v30  ;;  %1669 = vmatpush1.bf16.msra.mxu0 %v2357_v2  ;;  %v958_v26 = vpop.f32.mrb[14].mxu1  ;;  %v2384_v30 = vld [vmem:[%s3587_s3 + $0x1a0] ss:$8 sps:$4 sm:$0xff]   ;;  %v1302_v2 = vrot.slane %v1293_v52, %v1203_v16  ;;  %v1821_v16 = vld [vmem:[%s3591_s7 + $0x18] sm:$0xff] }
 0x179   :  { %1670 = vmatprep.subr.bf16.mxu0 %v2362_v17  ;;  %v959_v33 = vpop.f32.mrb[15].mxu1  ;;  %v1818_v4 = vld [vmem:[%s3591_s7] sm:$0xff] }
 0x17c   :  { %1671 = vmatpush1.bf16.msra.mxu0 %v2360_v53 }
 0x17d   :  { %1672 = vmatprep.subr.bf16.mxu0 %v2365_v10 }
 0x180   :  { %1673 = vmatpush1.bf16.msra.mxu0 %v2363_v21 }
 0x181   :  { %1674 = vmatprep.subr.bf16.mxu0 %v2368_v14  ;;  %v2202_v14 = vpack.c.bf16 %v1821_v16, %v1820_v48 }
 0x184   :  { %1675 = vmatpush1.bf16.msra.mxu0 %v2366_v36  ;;  %v1822_v36 = vld [vmem:[%s3591_s7 + $0x20] sm:$0xff] }
 0x185   :  { %1676 = vmatprep.subr.bf16.mxu0 %v2371_v58  ;;  %v1823_v58 = vld [vmem:[%s3591_s7 + $0x28] sm:$0xff] }
 0x186   :  { %v1184_v22 = vpop.f32.mrb[16].mxu1  ;;  %v2205_v18 = vpack.c.bf16 %v1823_v58, %v1822_v36 }
 0x187   :  { %v1193_v1 = vadd.f32 %v1184_v22, %v955_v12  ;;  %v1186_v11 = vpop.f32.mrb[17].mxu1 }
 0x188   :  { %v1194_v23 = vadd.f32 %v1186_v11, %v957_v37  ;;  %1677 = vmatpush1.bf16.msra.mxu0 %v2369_v19  ;;  %v1188_v25 = vpop.f32.mrb[18].mxu1  ;;  %v1819_v37 = vld [vmem:[%s3591_s7 + $0x8] sm:$0xff]  ;;  %v1824_v19 = vld [vmem:[%s3591_s7 + $0x30] sm:$0xff] }
 0x189   :  { %v1219_v7 = vadd.f32 %v3309_v47, %v1193_v1  ;;  %1678 = vmatprep.subr.bf16.mxu0 %v2374_v15  ;;  %v1189_v5 = vpop.f32.mrb[19].mxu1  ;;  %v2378_v47 = vld [vmem:[%s3587_s3 + $0x180] ss:$8 sps:$4 sm:$0xff]   ;;  %v2199_v21 = vpack.c.bf16 %v1819_v37, %v1818_v4  ;;  %v1825_v15 = vld [vmem:[%s3591_s7 + $0x38] sm:$0xff] }
 0x18a   :  { %v1220_v0 = vadd.f32 %v1212_v62, %v1194_v23  ;;  %v2208_v22 = vpack.c.bf16 %v1825_v15, %v1824_v19  ;;  %v1826_v62 = vld [vmem:[%s3591_s7 + $0x40] sm:$0xff]  ;;  %v1827_v1 = vld [vmem:[%s3591_s7 + $0x48] sm:$0xff]  ;;  %v1828_v23 = vld [vmem:[%s3591_s7 + $0x50] sm:$0xff] }
 0x18b   :  { %v1223_v43 = vmax.f32 %v1219_v7, 0.0  ;;  %v2211_v11 = vpack.c.bf16 %v1827_v1, %v1826_v62  ;;  %v1830_v7 = vld [vmem:[%s3591_s7 + $0x60] sm:$0xff] }
 0x18c   :  { %v1224_v54 = vmax.f32 %v1220_v0, 0.0  ;;  %1679 = vmatpush1.bf16.msra.mxu0 %v2372_v34  ;;  %v1829_v34 = vld [vmem:[%s3591_s7 + $0x58] sm:$0xff]  ;;  %v1832_v0 = vld [vmem:[%s3591_s7 + $0x70] sm:$0xff] }
 0x18d   :  { %1680 = vmatprep.subr.bf16.mxu0 %v2377_v9  ;;  %v1227_v44 = vpack.c.bf16 %v1223_v43, %v1223_v43  ;;  %v2214_v25 = vpack.c.bf16 %v1829_v34, %v1828_v23  ;;  %v1831_v9 = vld [vmem:[%s3591_s7 + $0x68] sm:$0xff] }
 0x18e   :  { %v1228_v28 = vpack.c.bf16 %v1224_v54, %v1224_v54  ;;  %v2217_v5 = vpack.c.bf16 %v1831_v9, %v1830_v7  ;;  %v1833_v54 = vld [vmem:[%s3591_s7 + $0x78] sm:$0xff]  ;;  %s1918_s7 = sshll.u32 %s2455_s27, 4  ;;  %s1919_s7 = int_to_ptr.vmem [resolvable:$true] %s1918_s7 }
 0x18f   :  { %s2424_s28 = scalar_lea.vmem %s1919_s7, 128  ;;  %p2429_p9 = scmp.lt.s32.totalorder %s1919_s7, %s1919_s7 }
 0x190   :  { %1681 = vmatpush1.bf16.msra.mxu0 %v2375_v46  ;;  %1698 = vmatprep.mubr.bf16.mxu0 %v1228_v28  ;;  %v2220_v46 = vpack.c.bf16 %v1833_v54, %v1832_v0  ;;  %p2425_p8 = scmp.ne.s32.totalorder %s1919_s7, %s2424_s28  ;;  %p2430_p10 = scmp.lt.s32.totalorder %s2424_s28, %s2424_s28 }
 0x191   :  { %1682 = vmatprep.subr.bf16.mxu0 %v2380_v27  ;;  %v2454_v27 = vmov 0.0  }
 0x192   :  { %p2431_p11 = por %p2430_p10, %p2429_p9 }
 0x194   :  { %1683 = vmatpush1.bf16.msra.mxu0 %v2378_v47  ;;  %v2077_v47 = vld [vmem:[%s3590_s6] ss:$0 sm:$0xff]  ;;  %p2432_p12 = pnand %p2431_p11, %p2425_p8 }
 0x195   :  { %1684 = vmatprep.subr.bf16.mxu0 %v2383_v59 }
 0x198   :  { %1685 = vmatpush1.bf16.msra.mxu0 %v2381_v29 }
 0x199   :  { %1686 = vmatprep.subr.bf16.mxu0 %v2386_v63 }
 0x19c   :  { %1687 = vmatpush1.bf16.msra.mxu0 %v2384_v30  ;;  %v2078_v30 = vld [vmem:[%s3592_s8] ss:$0 sm:$0xff] }
 0x19d   :  { %1688 = vmatprep.subr.bf16.mxu0 %v2389_v32 }
 0x1a0   :  { %1689 = vmatpush1.bf16.msra.mxu0 %v2387_v6 }
 0x1a1   :  { %1690 = vmatprep.subr.bf16.mxu0 %v2392_v20 }
 0x1a4   :  { %1691 = vmatpush1.bf16.msra.mxu0 %v2390_v35 }
 0x1a5   :  { %1692 = vmatprep.subr.bf16.mxu0 %v2395_v56 }
 0x1a8   :  { %1693 = vmatpush1.bf16.msra.mxu0 %v2393_v39 }
 0x1a9   :  { %1694 = vmatprep.subr.bf16.mxu0 %v2398_v40 }
 0x1ac   :  { %1695 = vmatpush1.bf16.msra.mxu0 %v2396_v24 }
 0x1ad   :  { %1696 = vmatprep.subr.bf16.mxu0 %v2401_v41 }
 0x1b0   :  { %1697 = vmatpush1.bf16.msra.mxu0 %v2399_v42 }
 0x1b3   :  { %1699 = vmatmul.mubr.bf16.vlgmr.msra.gmra.mrb[4].mxu0 %v1227_v44 }
 0x286   :  { %v1700_v17 = vpop.f32.mrb[4].mxu0 }
 0x287   :  { %v2222_v3 = vadd.f32 %v1700_v17, %v1298_v61  ;;  %v1702_v12 = vpop.f32.mrb[5].mxu0 }
 0x288   :  { %v2223_v53 = vadd.f32 %v1702_v12, %v1302_v2  ;;  %v1704_v26 = vpop.f32.mrb[6].mxu0 }
 0x289   :  { %v1705_v10 = vpop.f32.mrb[7].mxu0  ;;  %v1707_v13 = vmax.f32 %v2222_v3, 0.0 }
 0x28a   :  { %v1708_v33 = vmax.f32 %v2223_v53, 0.0 }
 0x28c   :  { %1812 = vmatprep.mubr.f32.mxu1 %v1708_v33 }
 0x28d   :  { %1813 = vmatmul.mubr.f32.vlgmr.msra.gmra.mrb[20].mxu1 %v1707_v13 }
 0x28e   :  { %2200 = vmatpush3.bf16.msra.mxu1 %v2199_v21  ;;  %2163 = vmatprep.mubr.msk.f32.mxu1 %vm2453_vm8, %v2454_v27 }
 0x28f   :  { %2201 = vmatprep.subr.bf16.mxu1 %v2452_v57 }
 0x292   :  { %2203 = vmatpush3.bf16.msra.mxu1 %v2202_v14 }
 0x293   :  { %2204 = vmatprep.subr.bf16.mxu1 %v2452_v57 }
 0x296   :  { %2206 = vmatpush3.bf16.msra.mxu1 %v2205_v18 }
 0x297   :  { %2207 = vmatprep.subr.bf16.mxu1 %v2452_v57 }
 0x29a   :  { %2209 = vmatpush3.bf16.msra.mxu1 %v2208_v22 }
 0x29b   :  { %2210 = vmatprep.subr.bf16.mxu1 %v2452_v57 }
 0x29e   :  { %2212 = vmatpush3.bf16.msra.mxu1 %v2211_v11 }
 0x29f   :  { %2213 = vmatprep.subr.bf16.mxu1 %v2452_v57 }
 0x2a2   :  { %2215 = vmatpush3.bf16.msra.mxu1 %v2214_v25 }
 0x2a3   :  { %2216 = vmatprep.subr.bf16.mxu1 %v2452_v57 }
 0x2a6   :  { %2218 = vmatpush3.bf16.msra.mxu1 %v2217_v5 }
 0x2a7   :  { %2219 = vmatprep.subr.bf16.mxu1 %v2452_v57 }
 0x2aa   :  { %2221 = vmatpush3.bf16.msra.mxu1 %v2220_v46 }
 0x360   :  { %v2111_v28 = vpop.f32.mrb[20].mxu1 }
 0x361   :  { %v2112_v59 = vpop.f32.mrb[21].mxu1 }
 0x362   :  { %v2113_v29 = vadd.f32 %v2112_v59, %v2111_v28 }
 0x364   :  { %v1815_v63 = vadd.f32 %v2113_v29, %v2077_v47 }
 0x366   :  { %2164 = vmatmul.mubr.f32.vlgmr.msra.gmra.mrb[22].mxu1 %v1815_v63 }
 0x439   :  { %v1907_v32 = vpop.f32.mrb[22].mxu1 }
 0x43a   :  { %v1908_v6 = vadd.f32 %v2078_v30, %v1907_v32  ;;  %v2165_v20 = vpop.f32.mrb[23].mxu1 }
 0x43c   :  { %1911 = vst [vmem:[#allocation5] sm:$0xff] %v1908_v6 }
 0x43d   :  { %2435 = shalt.err (!%p2432_p12)
}
 0x43e   :  { %s2436_s30 = scalar_lea.hbm %s3593_s9, 128 }
 0x43f   :  { %p2437_p13 = scmp.ne.s32.totalorder %s3593_s9, %s2436_s30  ;;  %p2440_p0 = scmp.lt.u32.totalorder %s2436_s30, %s3593_s9 }
 0x441   :  { %p2442_p1 = pnand %p2440_p0, %p2437_p13 }
 0x443   :  { %2445 = shalt.err (!%p2442_p1)
}
 0x444   :  { %1921 = dma.vmem_to_hbm [thread:$0]  %s1919_s7, 128, %s3593_s9, [#allocation4]  }
 0x445   :  { %2448 = dma.done.wait [#allocation4], 128  }
 0x446   :  { %2449 = vsyncadd [#allocation4], 4294967168 }
 0x447   :  { %1925 = vsyncpa [#allocation3], 1 }
 0x448   :  { %1926 = vsyncpa [#allocation4], 1 }

</bundles_post_ra>
